<compile_context>
chip_gen: v6e
topology: v6e:2x2x1
jax: 0.10.0
libtpu: 0.0.40
codegen_flags: <defaults>
</compile_context>

<pallas_src>
import functools

import jax
import jax.numpy as jnp
from jax import lax
from jax.experimental import pallas as pl
from jax.experimental.pallas import tpu as pltpu


def _round_up(x, m):
    return ((x + m - 1) // m) * m


@functools.lru_cache(maxsize=None)
def _vmem_limit_bytes():
    """Per-generation VMEM limit: ~112 MiB on v5e/v6e (128 MiB), ~48 MiB on v7x (64 MiB)."""
    try:
        cap = int(pltpu.get_tpu_info().vmem_capacity_bytes)
        return int(max(32 << 20, min(cap - (16 << 20), 112 << 20)))
    except Exception:
        return 48 << 20  # safe on every generation


# ------------------- fused matmul: LN? -> x@w + b -> GELU? -> +res? -------------------

def _fused_matmul_kernel(*refs, ln, act, res, eps):
    it = iter(refs)
    x_ref = next(it)
    g_ref = next(it) if ln else None
    lb_ref = next(it) if ln else None
    w_ref = next(it)
    b_ref = next(it)
    r_ref = next(it) if res else None
    o_ref = next(it)
    xn_ref = next(it) if ln else None   # (tm, K) normalized-x cache (VMEM scratch)

    if ln:
        # LayerNorm prologue in f32, computed once per row tile (j == 0) and cached;
        # reused for every N tile (N axis is innermost / "arbitrary", so j sweeps
        # 0..gn-1 per row tile on one core; the x block is not re-fetched across j).
        @pl.when(pl.program_id(1) == 0)
        def _ln():
            xf = x_ref[...].astype(jnp.float32)
            mu = jnp.mean(xf, axis=-1, keepdims=True)
            var = jnp.mean((xf - mu) ** 2, axis=-1, keepdims=True)
            xf = (xf - mu) * lax.rsqrt(var + eps)
            xf = xf * g_ref[...].astype(jnp.float32) + lb_ref[...].astype(jnp.float32)
            xn_ref[...] = xf.astype(xn_ref.dtype)
        x = xn_ref[...]
    else:
        x = x_ref[...]

    # Full-K, native-dtype MXU matmul (bf16 in -> f32 accumulate when weights are bf16).
    y = jnp.dot(x, w_ref[...], preferred_element_type=jnp.float32)
    y = y + b_ref[...].astype(jnp.float32)
    if act == "gelu":
        # tanh-approximate GELU (see TODO at top of file).
        y = 0.5 * y * (1.0 + jnp.tanh(0.7978845608028654 * (y + 0.044715 * y * y * y)))
    if res:
        y = y + r_ref[...].astype(jnp.float32)
    o_ref[...] = y.astype(o_ref.dtype)


def fused_linear(x, w, b, *, ln=None, activation=None, residual=None,
                 eps=1e-5, out_dtype=None):
    """y = [residual +] act( LN?(x) @ w + b ).  2-D (M-tiles, N-tiles) grid, full-K tiles."""
    M, K = x.shape
    Kw, N = w.shape
    assert K == Kw
    out_dtype = out_dtype or x.dtype

    # Row tile: 256-aligned for MXU row utilization; small M rounds up to the sublane
    # packing (16 rows for bf16, 8 for f32).  Ragged M is zero-padded (no-op if aligned).
    sub = 16 if jnp.dtype(x.dtype).itemsize < 4 else 8
    tm = 256 if M >= 256 else _round_up(M, sub)
    Mp = _round_up(M, tm)

    # Lane tile: multiple of 128 (lane-dense stores); largest of 512/384/256/128 that
    # divides the 128-padded N.
    Np = _round_up(N, 128)
    tn = 128
    for cand in (512, 384, 256, 128):
        if cand <= Np and Np % cand == 0:
            tn = cand
            break
    gm, gn = Mp // tm, Np // tn

    if Mp != M:
        x = jnp.pad(x, ((0, Mp - M), (0, 0)))
    if Np != N:
        w = jnp.pad(w, ((0, 0), (0, Np - N)))
        b = jnp.pad(b, ((0, Np - N),))
    if residual is not None and (Mp != M or Np != N):
        residual = jnp.pad(residual, ((0, Mp - M), (0, Np - N)))

    kernel = functools.partial(_fused_matmul_kernel, ln=ln is not None,
                               act=activation, res=residual is not None, eps=eps)

    in_specs = [pl.BlockSpec((tm, K), lambda i, j: (i, 0))]
    inputs = [x]
    if ln is not None:
        g, lb = ln
        in_specs += [pl.BlockSpec((1, K), lambda i, j: (0, 0)),
                     pl.BlockSpec((1, K), lambda i, j: (0, 0))]
        inputs += [g.reshape(1, K), lb.reshape(1, K)]
    in_specs += [pl.BlockSpec((K, tn), lambda i, j: (0, j)),
                 pl.BlockSpec((1, tn), lambda i, j: (0, j))]
    inputs += [w, b.reshape(1, Np)]
    if residual is not None:
        in_specs += [pl.BlockSpec((tm, tn), lambda i, j: (i, j))]
        inputs += [residual]

    scratch = [pltpu.VMEM((tm, K), w.dtype)] if ln is not None else []

    x_it = jnp.dtype(x.dtype).itemsize
    w_it = jnp.dtype(w.dtype).itemsize
    o_it = jnp.dtype(out_dtype).itemsize
    bytes_accessed = (Mp * K * x_it                  # x row tiles (resident across j)
                      + gm * K * Np * w_it           # weights re-streamed per row tile
                      + Mp * Np * o_it
                      + (Mp * Np * x_it if residual is not None else 0))
    cost = pl.CostEstimate(
        flops=int(2 * Mp * Np * K),
        transcendentals=int(Mp * Np if activation == "gelu" else 0),
        bytes_accessed=int(bytes_accessed))

    out = pl.pallas_call(
        kernel,
        out_shape=jax.ShapeDtypeStruct((Mp, Np), out_dtype),
        grid=(gm, gn),
        in_specs=in_specs,
        out_specs=pl.BlockSpec((tm, tn), lambda i, j: (i, j)),
        scratch_shapes=scratch,
        compiler_params=pltpu.CompilerParams(
            dimension_semantics=("parallel",
                                 "arbitrary" if ln is not None else "parallel"),
            vmem_limit_bytes=_vmem_limit_bytes()),
        cost_estimate=cost,
    )(*inputs)
    return out[:M, :N]


# ------------------------------ attention kernel ------------------------------

def _attn_kernel(q_ref, k_ref, v_ref, o_ref, *, scale):
    # One (batch, head) pair per grid step; q/k/v/o blocks are dense (S, Dh) slabs.
    q = q_ref[...] * scale                                   # fold 1/sqrt(Dh) into q
    s = lax.dot_general(q, k_ref[...], (((1,), (1,)), ((), ())),
                        preferred_element_type=jnp.float32)  # (S, S) f32
    s = s - jnp.max(s, axis=-1, keepdims=True)
    p = jnp.exp(s)
    p = p * pl.reciprocal(jnp.sum(p, axis=-1, keepdims=True), approx=True)
    o = jnp.dot(p.astype(v_ref.dtype), v_ref[...], preferred_element_type=jnp.float32)
    o_ref[...] = o.astype(o_ref.dtype)


def pallas_attention(qkv, B, S, heads, dh, scale):
    """qkv: (B*S, 3E) laid out [q | k | v].  Returns (B*S, E) with heads merged."""
    E = heads * dh
    # One XLA transpose to the canonical (3, B, H, S, Dh) layout so every Pallas block
    # is a dense, fully aligned slab (no lane-sparse 64-column slicing in-kernel).
    qkvh = qkv.reshape(B, S, 3, heads, dh).transpose(2, 0, 3, 1, 4)
    item = jnp.dtype(qkv.dtype).itemsize
    cost = pl.CostEstimate(
        flops=int(4 * B * heads * S * S * dh),
        transcendentals=int(B * heads * S * S),
        bytes_accessed=int(3 * B * S * E * item + B * S * E * item))
    blk = (None, None, None, S, dh)
    out = pl.pallas_call(
        functools.partial(_attn_kernel, scale=scale),
        out_shape=jax.ShapeDtypeStruct((B, heads, S, dh), qkv.dtype),
        grid=(B, heads),
        in_specs=[pl.BlockSpec(blk, lambda b, h: (0, b, h, 0, 0)),
                  pl.BlockSpec(blk, lambda b, h: (1, b, h, 0, 0)),
                  pl.BlockSpec(blk, lambda b, h: (2, b, h, 0, 0))],
        out_specs=pl.BlockSpec((None, None, S, dh), lambda b, h: (b, h, 0, 0)),
        compiler_params=pltpu.CompilerParams(
            dimension_semantics=("parallel", "parallel"),
            vmem_limit_bytes=_vmem_limit_bytes()),
        cost_estimate=cost,
    )(qkvh, qkvh, qkvh)
    # TODO(synk): for S >~ 1k (high-res ViT) switch to flash-style KV tiling so the f32
    # SxS score tile stays bounded on v7x's 64 MiB VMEM.
    return out.transpose(0, 2, 1, 3).reshape(B * S, E)


# ------------------------------ parameters ------------------------------

def init_params(key, cfg, dtype=jnp.float32):
    keys = iter(jax.random.split(key, 64))
    E = cfg["embed_dim"]

    def nrm(shape, std=0.02):
        return (std * jax.random.normal(next(keys), shape)).astype(dtype)

    pdim = cfg["C"] * cfg["patch"] * cfg["patch"]
    p = {
        "patch_w": nrm((pdim, E)),
        "patch_b": jnp.zeros((E,), dtype),
        "cls": nrm((1, 1, E)),
        "pos": nrm((1, cfg["n_tokens"], E)),
        "blocks": [],
        "head_ln_g": jnp.ones((E,), dtype),
        "head_ln_b": jnp.zeros((E,), dtype),
        "head_w": nrm((E, cfg["n_features"])),
        "head_b": jnp.zeros((cfg["n_features"],), dtype),
    }
    for _ in range(cfg["depth"]):
        p["blocks"].append({
            "ln1_g": jnp.ones((E,), dtype), "ln1_b": jnp.zeros((E,), dtype),
            "qkv_w": nrm((E, 3 * E)), "qkv_b": jnp.zeros((3 * E,), dtype),
            "proj_w": nrm((E, E)), "proj_b": jnp.zeros((E,), dtype),
            "ln2_g": jnp.ones((E,), dtype), "ln2_b": jnp.zeros((E,), dtype),
            "mlp_w1": nrm((E, cfg["mlp_hidden"])),
            "mlp_b1": jnp.zeros((cfg["mlp_hidden"],), dtype),
            "mlp_w2": nrm((cfg["mlp_hidden"], E)),
            "mlp_b2": jnp.zeros((E,), dtype),
        })
    return p


# ------------------------------ forward pass ------------------------------

def vit_wrapper_forward(params, x, cfg):
    B, C, H, W = x.shape
    pch, E, heads = cfg["patch"], cfg["embed_dim"], cfg["heads"]
    dh = E // heads
    nH, nW = H // pch, W // pch
    N = nH * nW
    S = N + 1
    scale = 1.0 / float(dh) ** 0.5

    # im2col (glue): (B,C,H,W) -> (B*N, C*p*p), PyTorch Conv2d (C, ph, pw) flatten order.
    patches = (x.reshape(B, C, nH, pch, nW, pch)
                 .transpose(0, 2, 4, 1, 3, 5)
                 .reshape(B * N, C * pch * pch)).astype(params["patch_w"].dtype)
    tok = fused_linear(patches, params["patch_w"], params["patch_b"]).reshape(B, N, E)

    cls = jnp.broadcast_to(params["cls"], (B, 1, E)).astype(tok.dtype)
    xseq = jnp.concatenate([cls, tok], axis=1) + params["pos"]
    x2d = xseq.reshape(B * S, E)

    for blk in params["blocks"]:
        # pre-norm MHSA: LN fused into QKV matmul, residual fused into proj epilogue.
        qkv = fused_linear(x2d, blk["qkv_w"], blk["qkv_b"],
                           ln=(blk["ln1_g"], blk["ln1_b"]))
        attn = pallas_attention(qkv, B, S, heads, dh, scale)
        x2d = fused_linear(attn, blk["proj_w"], blk["proj_b"], residual=x2d)

        # pre-norm MLP: LN + GELU fused into W1, residual fused into W2 epilogue.
        hmid = fused_linear(x2d, blk["mlp_w1"], blk["mlp_b1"],
                            ln=(blk["ln2_g"], blk["ln2_b"]), activation="gelu")
        x2d = fused_linear(hmid, blk["mlp_w2"], blk["mlp_b2"], residual=x2d)

    cls_tok = x2d.reshape(B, S, E)[:, 0, :]  # features['cls']
    # ViTWrapper head: nn.Sequential(LayerNorm, Linear) as one fused LN+matmul kernel.
    return fused_linear(cls_tok, params["head_w"], params["head_b"],
                        ln=(params["head_ln_g"], params["head_ln_b"]))


# ------------------------------ pure-JAX reference ------------------------------

def _ref_forward(params, x, cfg):
    B, C, H, W = x.shape
    pch, E, heads = cfg["patch"], cfg["embed_dim"], cfg["heads"]
    dh = E // heads
    nH, nW = H // pch, W // pch
    N = nH * nW
    S = N + 1
    scale = 1.0 / float(dh) ** 0.5

    def ln(z, g, b, eps=1e-5):
        mu = jnp.mean(z, -1, keepdims=True)
        var = jnp.mean((z - mu) ** 2, -1, keepdims=True)
        return (z - mu) * lax.rsqrt(var + eps) * g + b

    def gelu(z):
        return 0.5 * z * (1.0 + jnp.tanh(0.7978845608028654 * (z + 0.044715 * z ** 3)))

    patches = (x.reshape(B, C, nH, pch, nW, pch)
                 .transpose(0, 2, 4, 1, 3, 5)
                 .reshape(B * N, C * pch * pch))
    tok = (patches @ params["patch_w"] + params["patch_b"]).reshape(B, N, E)
    xs = jnp.concatenate([jnp.broadcast_to(params["cls"], (B, 1, E)), tok], 1) + params["pos"]
    for blk in params["blocks"]:
        h = ln(xs.reshape(B * S, E), blk["ln1_g"], blk["ln1_b"])
        qkv = (h @ blk["qkv_w"] + blk["qkv_b"]).reshape(B, S, 3, heads, dh).transpose(2, 0, 3, 1, 4)
        q, k, v = qkv[0], qkv[1], qkv[2]
        s = jnp.einsum("bhqd,bhkd->bhqk", q, k) * scale
        p = jax.nn.softmax(s, axis=-1)
        o = jnp.einsum("bhqk,bhkd->bhqd", p, v).transpose(0, 2, 1, 3).reshape(B * S, E)
        xs = xs + (o @ blk["proj_w"] + blk["proj_b"]).reshape(B, S, E)
        h = ln(xs.reshape(B * S, E), blk["ln2_g"], blk["ln2_b"])
        m = gelu(h @ blk["mlp_w1"] + blk["mlp_b1"]) @ blk["mlp_w2"] + blk["mlp_b2"]
        xs = xs + m.reshape(B, S, E)
    cls_tok = xs[:, 0, :]
    return ln(cls_tok, params["head_ln_g"], params["head_ln_b"]) @ params["head_w"] + params["head_b"]


# ------------------------------ main ------------------------------

if __name__ == "__main__":
    B, Hh, Ww = 2, 16, 16
    cfg = dict(C=4, patch=4, embed_dim=32, depth=2, heads=4,
               mlp_hidden=64, n_features=8)
    cfg["n_tokens"] = (Hh // cfg["patch"]) * (Ww // cfg["patch"]) + 1

    key = jax.random.PRNGKey(0)
    k_param, k_x = jax.random.split(key)
    params = init_params(k_param, cfg, dtype=jnp.float32)
    x = jax.random.normal(k_x, (B, cfg["C"], Hh, Ww), dtype=jnp.float32)  # NCHW

    fwd = jax.jit(lambda p, xx: vit_wrapper_forward(p, xx, cfg))
    out = jax.block_until_ready(fwd(params, x))

    ref = _ref_forward(params, x, cfg)
    assert out.shape == (B, cfg["n_features"])
    assert bool(jnp.all(jnp.isfinite(out)))
    assert bool(jnp.allclose(out, ref, rtol=5e-3, atol=5e-3)), float(jnp.max(jnp.abs(out - ref)))

    # bf16 smoke run: weights/activations stored in bf16 (native MXU dtype),
    # f32 accumulation + f32 LN/softmax inside the kernels.
    params_bf16 = jax.tree_util.tree_map(lambda a: a.astype(jnp.bfloat16), params)
    out_bf16 = jax.block_until_ready(
        jax.jit(lambda p, xx: vit_wrapper_forward(p, xx, cfg))(
            params_bf16, x.astype(jnp.bfloat16)))
    assert out_bf16.shape == (B, cfg["n_features"])
    assert bool(jnp.all(jnp.isfinite(out_bf16.astype(jnp.float32))))

    print("KERNEL_OK")
</pallas_src>

<mosaic_0001>
module attributes {stable_mosaic.version = 11 : i64} {
  func.func @_fused_matmul_kernel(%arg0: i32, %arg1: i32, %arg2: memref<32x64xf32, #tpu.memory_space<vmem>>, %arg3: memref<64x128xf32, #tpu.memory_space<vmem>>, %arg4: memref<1x128xf32, #tpu.memory_space<vmem>>, %arg5: memref<32x128xf32, #tpu.memory_space<vmem>>) attributes {dimension_semantics = [#tpu.dimension_semantics<parallel>, #tpu.dimension_semantics<parallel>], iteration_bounds = array<i64: 1, 1>, scalar_prefetch = 0 : i64, scratch_operands = 0 : i64, tpu.core_type = #tpu.core_type<tc>, window_params = [{transform_indices = @transform_0, window_bounds = array<i64: 32, 64>}, {transform_indices = @transform_1, window_bounds = array<i64: 64, 128>}, {transform_indices = @transform_2, window_bounds = array<i64: 1, 128>}, {transform_indices = @transform_3, window_bounds = array<i64: 32, 128>}]} {
    %c0 = arith.constant 0 : index
    %c0_0 = arith.constant 0 : index
    %0 = vector.load %arg2[%c0, %c0_0] : memref<32x64xf32, #tpu.memory_space<vmem>>, vector<32x64xf32>
    %c0_1 = arith.constant 0 : index
    %c0_2 = arith.constant 0 : index
    %1 = vector.load %arg3[%c0_1, %c0_2] : memref<64x128xf32, #tpu.memory_space<vmem>>, vector<64x128xf32>
    %cst = arith.constant dense<0.000000e+00> : vector<32x128xf32>
    %2 = tpu.matmul %0, %1, %cst {dimension_numbers = #tpu.dot_dimension_numbers<[1], [0], [0], [1], [0, 0, 1, 1], [], []>} : vector<32x64xf32>, vector<64x128xf32>, vector<32x128xf32> -> vector<32x128xf32>
    %c0_3 = arith.constant 0 : index
    %c0_4 = arith.constant 0 : index
    %3 = vector.load %arg4[%c0_3, %c0_4] : memref<1x128xf32, #tpu.memory_space<vmem>>, vector<1x128xf32>
    %4 = vector.broadcast %3 : vector<1x128xf32> to vector<32x128xf32>
    %5 = arith.addf %2, %4 : vector<32x128xf32>
    %c0_5 = arith.constant 0 : index
    %c0_6 = arith.constant 0 : index
    %6 = vector.load %arg5[%c0_5, %c0_6] : memref<32x128xf32, #tpu.memory_space<vmem>>, vector<32x128xf32>
    tpu.vector_store %arg5[%c0_5, %c0_6], %5 {strides = array<i32>} : memref<32x128xf32, #tpu.memory_space<vmem>>, vector<32x128xf32>,
    return
  }
  func.func @transform_0(%arg0: i32, %arg1: i32) -> (i32, i32) {
    %c0_i32 = arith.constant 0 : i32
    %c0_i32_0 = arith.constant 0 : i32
    return %arg0, %c0_i32 : i32, i32
  }
  func.func @transform_1(%arg0: i32, %arg1: i32) -> (i32, i32) {
    %c0_i32 = arith.constant 0 : i32
    %c0_i32_0 = arith.constant 0 : i32
    return %c0_i32, %arg1 : i32, i32
  }
  func.func @transform_2(%arg0: i32, %arg1: i32) -> (i32, i32) {
    %c0_i32 = arith.constant 0 : i32
    %c0_i32_0 = arith.constant 0 : i32
    return %c0_i32, %arg1 : i32, i32
  }
  func.func @transform_3(%arg0: i32, %arg1: i32) -> (i32, i32) {
    %c0_i32 = arith.constant 0 : i32
    return %arg0, %arg1 : i32, i32
  }
}

module attributes {stable_mosaic.version = 11 : i64} {
  func.func @_fused_matmul_kernel(%arg0: i32, %arg1: i32, %arg2: memref<40x32xf32, #tpu.memory_space<vmem>>, %arg3: memref<1x32xf32, #tpu.memory_space<vmem>>, %arg4: memref<1x32xf32, #tpu.memory_space<vmem>>, %arg5: memref<32x128xf32, #tpu.memory_space<vmem>>, %arg6: memref<1x128xf32, #tpu.memory_space<vmem>>, %arg7: memref<40x128xf32, #tpu.memory_space<vmem>>, %arg8: memref<40x32xf32, #tpu.memory_space<vmem>>) attributes {dimension_semantics = [#tpu.dimension_semantics<parallel>, #tpu.dimension_semantics<arbitrary>], iteration_bounds = array<i64: 1, 1>, scalar_prefetch = 0 : i64, scratch_operands = 1 : i64, tpu.core_type = #tpu.core_type<tc>, window_params = [{transform_indices = @transform_0, window_bounds = array<i64: 40, 32>}, {pipeline_mode = #tpu.pipeline_mode<synchronous>, transform_indices = @transform_1, window_bounds = array<i64: 1, 32>}, {pipeline_mode = #tpu.pipeline_mode<synchronous>, transform_indices = @transform_2, window_bounds = array<i64: 1, 32>}, {transform_indices = @transform_3, window_bounds = array<i64: 32, 128>}, {transform_indices = @transform_4, window_bounds = array<i64: 1, 128>}, {transform_indices = @transform_5, window_bounds = array<i64: 40, 128>}]} {
    %c0_i32 = arith.constant 0 : i32
    %0 = arith.cmpi eq, %arg1, %c0_i32 : i32
    %1 = arith.extui %0 : i1 to i32
    %c0_i32_0 = arith.constant 0 : i32
    %2 = arith.cmpi ne, %1, %c0_i32_0 : i32
    scf.if %2 {
      %c0_8 = arith.constant 0 : index
      %c0_9 = arith.constant 0 : index
      %10 = vector.load %arg2[%c0_8, %c0_9] : memref<40x32xf32, #tpu.memory_space<vmem>>, vector<40x32xf32>
      %cst_10 = arith.constant dense<0.000000e+00> : vector<40xf32>
      %11 = vector.multi_reduction <add>, %10, %cst_10 [1] : vector<40x32xf32> to vector<40xf32>
      %12 = vector.shape_cast %11 : vector<40xf32> to vector<40x1xf32>
      %cst_11 = arith.constant 3.200000e+01 : f32
      %13 = vector.broadcast %cst_11 : f32 to vector<40x1xf32>
      %14 = arith.divf %12, %13 : vector<40x1xf32>
      %15 = vector.broadcast %14 : vector<40x1xf32> to vector<40x32xf32>
      %16 = arith.subf %10, %15 : vector<40x32xf32>
      %17 = arith.mulf %16, %16 : vector<40x32xf32>
      %cst_12 = arith.constant dense<0.000000e+00> : vector<40xf32>
      %18 = vector.multi_reduction <add>, %17, %cst_12 [1] : vector<40x32xf32> to vector<40xf32>
      %19 = vector.shape_cast %18 : vector<40xf32> to vector<40x1xf32>
      %cst_13 = arith.constant 3.200000e+01 : f32
      %20 = vector.broadcast %cst_13 : f32 to vector<40x1xf32>
      %21 = arith.divf %19, %20 : vector<40x1xf32>
      %22 = vector.broadcast %14 : vector<40x1xf32> to vector<40x32xf32>
      %23 = arith.subf %10, %22 : vector<40x32xf32>
      %cst_14 = arith.constant 9.99999974E-6 : f32
      %24 = vector.broadcast %cst_14 : f32 to vector<40x1xf32>
      %25 = arith.addf %21, %24 : vector<40x1xf32>
      %26 = math.rsqrt %25 : vector<40x1xf32>
      %27 = vector.broadcast %26 : vector<40x1xf32> to vector<40x32xf32>
      %28 = arith.mulf %23, %27 : vector<40x32xf32>
      %c0_15 = arith.constant 0 : index
      %c0_16 = arith.constant 0 : index
      %29 = vector.load %arg3[%c0_15, %c0_16] : memref<1x32xf32, #tpu.memory_space<vmem>>, vector<1x32xf32>
      %30 = vector.broadcast %29 : vector<1x32xf32> to vector<40x32xf32>
      %31 = arith.mulf %28, %30 : vector<40x32xf32>
      %c0_17 = arith.constant 0 : index
      %c0_18 = arith.constant 0 : index
      %32 = vector.load %arg4[%c0_17, %c0_18] : memref<1x32xf32, #tpu.memory_space<vmem>>, vector<1x32xf32>
      %33 = vector.broadcast %32 : vector<1x32xf32> to vector<40x32xf32>
      %34 = arith.addf %31, %33 : vector<40x32xf32>
      %c0_19 = arith.constant 0 : index
      %c0_20 = arith.constant 0 : index
      %35 = vector.load %arg8[%c0_19, %c0_20] : memref<40x32xf32, #tpu.memory_space<vmem>>, vector<40x32xf32>
      tpu.vector_store %arg8[%c0_19, %c0_20], %34 {strides = array<i32>} : memref<40x32xf32, #tpu.memory_space<vmem>>, vector<40x32xf32>,
    } else {
    }
    %c0 = arith.constant 0 : index
    %c0_1 = arith.constant 0 : index
    %3 = vector.load %arg8[%c0, %c0_1] : memref<40x32xf32, #tpu.memory_space<vmem>>, vector<40x32xf32>
    %c0_2 = arith.constant 0 : index
    %c0_3 = arith.constant 0 : index
    %4 = vector.load %arg5[%c0_2, %c0_3] : memref<32x128xf32, #tpu.memory_space<vmem>>, vector<32x128xf32>
    %cst = arith.constant dense<0.000000e+00> : vector<40x128xf32>
    %5 = tpu.matmul %3, %4, %cst {dimension_numbers = #tpu.dot_dimension_numbers<[1], [0], [0], [1], [0, 0, 1, 1], [], []>} : vector<40x32xf32>, vector<32x128xf32>, vector<40x128xf32> -> vector<40x128xf32>
    %c0_4 = arith.constant 0 : index
    %c0_5 = arith.constant 0 : index
    %6 = vector.load %arg6[%c0_4, %c0_5] : memref<1x128xf32, #tpu.memory_space<vmem>>, vector<1x128xf32>
    %7 = vector.broadcast %6 : vector<1x128xf32> to vector<40x128xf32>
    %8 = arith.addf %5, %7 : vector<40x128xf32>
    %c0_6 = arith.constant 0 : index
    %c0_7 = arith.constant 0 : index
    %9 = vector.load %arg7[%c0_6, %c0_7] : memref<40x128xf32, #tpu.memory_space<vmem>>, vector<40x128xf32>
    tpu.vector_store %arg7[%c0_6, %c0_7], %8 {strides = array<i32>} : memref<40x128xf32, #tpu.memory_space<vmem>>, vector<40x128xf32>,
    return
  }
  func.func @transform_0(%arg0: i32, %arg1: i32) -> (i32, i32) {
    %c0_i32 = arith.constant 0 : i32
    %c0_i32_0 = arith.constant 0 : i32
    return %arg0, %c0_i32 : i32, i32
  }
  func.func @transform_1(%arg0: i32, %arg1: i32) -> (i32, i32) {
    %c0_i32 = arith.constant 0 : i32
    %c0_i32_0 = arith.constant 0 : i32
    %c0_i32_1 = arith.constant 0 : i32
    return %c0_i32, %c0_i32_0 : i32, i32
  }
  func.func @transform_2(%arg0: i32, %arg1: i32) -> (i32, i32) {
    %c0_i32 = arith.constant 0 : i32
    %c0_i32_0 = arith.constant 0 : i32
    %c0_i32_1 = arith.constant 0 : i32
    return %c0_i32, %c0_i32_0 : i32, i32
  }
  func.func @transform_3(%arg0: i32, %arg1: i32) -> (i32, i32) {
    %c0_i32 = arith.constant 0 : i32
    %c0_i32_0 = arith.constant 0 : i32
    return %c0_i32, %arg1 : i32, i32
  }
  func.func @transform_4(%arg0: i32, %arg1: i32) -> (i32, i32) {
    %c0_i32 = arith.constant 0 : i32
    %c0_i32_0 = arith.constant 0 : i32
    return %c0_i32, %arg1 : i32, i32
  }
  func.func @transform_5(%arg0: i32, %arg1: i32) -> (i32, i32) {
    %c0_i32 = arith.constant 0 : i32
    return %arg0, %arg1 : i32, i32
  }
}

module attributes {stable_mosaic.version = 11 : i64} {
  func.func @_attn_kernel(%arg0: i32, %arg1: i32, %arg2: memref<1x1x1x17x8xf32, #tpu.memory_space<vmem>>, %arg3: memref<1x1x1x17x8xf32, #tpu.memory_space<vmem>>, %arg4: memref<1x1x1x17x8xf32, #tpu.memory_space<vmem>>, %arg5: memref<1x1x17x8xf32, #tpu.memory_space<vmem>>) attributes {dimension_semantics = [#tpu.dimension_semantics<parallel>, #tpu.dimension_semantics<parallel>], iteration_bounds = array<i64: 2, 4>, scalar_prefetch = 0 : i64, scratch_operands = 0 : i64, tpu.core_type = #tpu.core_type<tc>, window_params = [{transform_indices = @transform_0, window_bounds = array<i64: 1, 1, 1, 17, 8>}, {transform_indices = @transform_1, window_bounds = array<i64: 1, 1, 1, 17, 8>}, {transform_indices = @transform_2, window_bounds = array<i64: 1, 1, 1, 17, 8>}, {transform_indices = @transform_3, window_bounds = array<i64: 1, 1, 17, 8>}]} {
    %c0 = arith.constant 0 : index
    %c0_0 = arith.constant 0 : index
    %c0_1 = arith.constant 0 : index
    %c0_2 = arith.constant 0 : index
    %c0_3 = arith.constant 0 : index
    %0 = vector.load %arg2[%c0, %c0_0, %c0_1, %c0_2, %c0_3] : memref<1x1x1x17x8xf32, #tpu.memory_space<vmem>>, vector<1x1x1x17x8xf32>
    %1 = vector.shape_cast %0 : vector<1x1x1x17x8xf32> to vector<17x8xf32>
    %cst = arith.constant 0.353553385 : f32
    %2 = vector.broadcast %cst : f32 to vector<17x8xf32>
    %3 = arith.mulf %1, %2 : vector<17x8xf32>
    %c0_4 = arith.constant 0 : index
    %c0_5 = arith.constant 0 : index
    %c0_6 = arith.constant 0 : index
    %c0_7 = arith.constant 0 : index
    %c0_8 = arith.constant 0 : index
    %4 = vector.load %arg3[%c0_4, %c0_5, %c0_6, %c0_7, %c0_8] : memref<1x1x1x17x8xf32, #tpu.memory_space<vmem>>, vector<1x1x1x17x8xf32>
    %5 = vector.shape_cast %4 : vector<1x1x1x17x8xf32> to vector<17x8xf32>
    %cst_9 = arith.constant dense<0.000000e+00> : vector<17x17xf32>
    %6 = tpu.matmul %3, %5, %cst_9 {dimension_numbers = #tpu.dot_dimension_numbers<[1], [1], [0], [0], [0, 0, 1, 0], [], []>} : vector<17x8xf32>, vector<17x8xf32>, vector<17x17xf32> -> vector<17x17xf32>
    %cst_10 = arith.constant dense<0xFF800000> : vector<17xf32>
    %7 = vector.multi_reduction <maximumf>, %6, %cst_10 [1] : vector<17x17xf32> to vector<17xf32>
    %8 = vector.shape_cast %7 : vector<17xf32> to vector<17x1xf32>
    %9 = vector.broadcast %8 : vector<17x1xf32> to vector<17x17xf32>
    %10 = arith.subf %6, %9 : vector<17x17xf32>
    %11 = math.exp %10 : vector<17x17xf32>
    %cst_11 = arith.constant dense<0.000000e+00> : vector<17xf32>
    %12 = vector.multi_reduction <add>, %11, %cst_11 [1] : vector<17x17xf32> to vector<17xf32>
    %13 = vector.shape_cast %12 : vector<17xf32> to vector<17x1xf32>
    %14 = tpu.reciprocal %13 {approx = true} : vector<17x1xf32> -> vector<17x1xf32>
    %15 = vector.broadcast %14 : vector<17x1xf32> to vector<17x17xf32>
    %16 = arith.mulf %11, %15 : vector<17x17xf32>
    %c0_12 = arith.constant 0 : index
    %c0_13 = arith.constant 0 : index
    %c0_14 = arith.constant 0 : index
    %c0_15 = arith.constant 0 : index
    %c0_16 = arith.constant 0 : index
    %17 = vector.load %arg4[%c0_12, %c0_13, %c0_14, %c0_15, %c0_16] : memref<1x1x1x17x8xf32, #tpu.memory_space<vmem>>, vector<1x1x1x17x8xf32>
    %18 = vector.shape_cast %17 : vector<1x1x1x17x8xf32> to vector<17x8xf32>
    %cst_17 = arith.constant dense<0.000000e+00> : vector<17x8xf32>
    %19 = tpu.matmul %16, %18, %cst_17 {dimension_numbers = #tpu.dot_dimension_numbers<[1], [0], [0], [1], [0, 0, 1, 1], [], []>} : vector<17x17xf32>, vector<17x8xf32>, vector<17x8xf32> -> vector<17x8xf32>
    %c0_18 = arith.constant 0 : index
    %c0_19 = arith.constant 0 : index
    %c0_20 = arith.constant 0 : index
    %c0_21 = arith.constant 0 : index
    %20 = vector.load %arg5[%c0_18, %c0_19, %c0_20, %c0_21] : memref<1x1x17x8xf32, #tpu.memory_space<vmem>>, vector<1x1x17x8xf32>
    %21 = vector.shape_cast %20 : vector<1x1x17x8xf32> to vector<17x8xf32>
    %22 = vector.shape_cast %19 : vector<17x8xf32> to vector<1x1x17x8xf32>
    tpu.vector_store %arg5[%c0_18, %c0_19, %c0_20, %c0_21], %22 {strides = array<i32>} : memref<1x1x17x8xf32, #tpu.memory_space<vmem>>, vector<1x1x17x8xf32>,
    return
  }
  func.func @transform_0(%arg0: i32, %arg1: i32) -> (i32, i32, i32, i32, i32) {
    %c0_i32 = arith.constant 0 : i32
    %c0_i32_0 = arith.constant 0 : i32
    %c0_i32_1 = arith.constant 0 : i32
    %c0_i32_2 = arith.constant 0 : i32
    return %c0_i32, %arg0, %arg1, %c0_i32_0, %c0_i32_1 : i32, i32, i32, i32, i32
  }
  func.func @transform_1(%arg0: i32, %arg1: i32) -> (i32, i32, i32, i32, i32) {
    %c1_i32 = arith.constant 1 : i32
    %c0_i32 = arith.constant 0 : i32
    %c0_i32_0 = arith.constant 0 : i32
    %c0_i32_1 = arith.constant 0 : i32
    return %c1_i32, %arg0, %arg1, %c0_i32, %c0_i32_0 : i32, i32, i32, i32, i32
  }
  func.func @transform_2(%arg0: i32, %arg1: i32) -> (i32, i32, i32, i32, i32) {
    %c2_i32 = arith.constant 2 : i32
    %c0_i32 = arith.constant 0 : i32
    %c0_i32_0 = arith.constant 0 : i32
    %c0_i32_1 = arith.constant 0 : i32
    return %c2_i32, %arg0, %arg1, %c0_i32, %c0_i32_0 : i32, i32, i32, i32, i32
  }
  func.func @transform_3(%arg0: i32, %arg1: i32) -> (i32, i32, i32, i32) {
    %c0_i32 = arith.constant 0 : i32
    %c0_i32_0 = arith.constant 0 : i32
    %c0_i32_1 = arith.constant 0 : i32
    return %arg0, %arg1, %c0_i32, %c0_i32_0 : i32, i32, i32, i32
  }
}

module attributes {stable_mosaic.version = 11 : i64} {
  func.func @_fused_matmul_kernel(%arg0: i32, %arg1: i32, %arg2: memref<40x32xf32, #tpu.memory_space<vmem>>, %arg3: memref<32x128xf32, #tpu.memory_space<vmem>>, %arg4: memref<1x128xf32, #tpu.memory_space<vmem>>, %arg5: memref<40x128xf32, #tpu.memory_space<vmem>>, %arg6: memref<40x128xf32, #tpu.memory_space<vmem>>) attributes {dimension_semantics = [#tpu.dimension_semantics<parallel>, #tpu.dimension_semantics<parallel>], iteration_bounds = array<i64: 1, 1>, scalar_prefetch = 0 : i64, scratch_operands = 0 : i64, tpu.core_type = #tpu.core_type<tc>, window_params = [{transform_indices = @transform_0, window_bounds = array<i64: 40, 32>}, {transform_indices = @transform_1, window_bounds = array<i64: 32, 128>}, {transform_indices = @transform_2, window_bounds = array<i64: 1, 128>}, {transform_indices = @transform_3, window_bounds = array<i64: 40, 128>}, {transform_indices = @transform_4, window_bounds = array<i64: 40, 128>}]} {
    %c0 = arith.constant 0 : index
    %c0_0 = arith.constant 0 : index
    %0 = vector.load %arg2[%c0, %c0_0] : memref<40x32xf32, #tpu.memory_space<vmem>>, vector<40x32xf32>
    %c0_1 = arith.constant 0 : index
    %c0_2 = arith.constant 0 : index
    %1 = vector.load %arg3[%c0_1, %c0_2] : memref<32x128xf32, #tpu.memory_space<vmem>>, vector<32x128xf32>
    %cst = arith.constant dense<0.000000e+00> : vector<40x128xf32>
    %2 = tpu.matmul %0, %1, %cst {dimension_numbers = #tpu.dot_dimension_numbers<[1], [0], [0], [1], [0, 0, 1, 1], [], []>} : vector<40x32xf32>, vector<32x128xf32>, vector<40x128xf32> -> vector<40x128xf32>
    %c0_3 = arith.constant 0 : index
    %c0_4 = arith.constant 0 : index
    %3 = vector.load %arg4[%c0_3, %c0_4] : memref<1x128xf32, #tpu.memory_space<vmem>>, vector<1x128xf32>
    %4 = vector.broadcast %3 : vector<1x128xf32> to vector<40x128xf32>
    %5 = arith.addf %2, %4 : vector<40x128xf32>
    %c0_5 = arith.constant 0 : index
    %c0_6 = arith.constant 0 : index
    %6 = vector.load %arg5[%c0_5, %c0_6] : memref<40x128xf32, #tpu.memory_space<vmem>>, vector<40x128xf32>
    %7 = arith.addf %5, %6 : vector<40x128xf32>
    %c0_7 = arith.constant 0 : index
    %c0_8 = arith.constant 0 : index
    %8 = vector.load %arg6[%c0_7, %c0_8] : memref<40x128xf32, #tpu.memory_space<vmem>>, vector<40x128xf32>
    tpu.vector_store %arg6[%c0_7, %c0_8], %7 {strides = array<i32>} : memref<40x128xf32, #tpu.memory_space<vmem>>, vector<40x128xf32>,
    return
  }
  func.func @transform_0(%arg0: i32, %arg1: i32) -> (i32, i32) {
    %c0_i32 = arith.constant 0 : i32
    %c0_i32_0 = arith.constant 0 : i32
    return %arg0, %c0_i32 : i32, i32
  }
  func.func @transform_1(%arg0: i32, %arg1: i32) -> (i32, i32) {
    %c0_i32 = arith.constant 0 : i32
    %c0_i32_0 = arith.constant 0 : i32
    return %c0_i32, %arg1 : i32, i32
  }
  func.func @transform_2(%arg0: i32, %arg1: i32) -> (i32, i32) {
    %c0_i32 = arith.constant 0 : i32
    %c0_i32_0 = arith.constant 0 : i32
    return %c0_i32, %arg1 : i32, i32
  }
  func.func @transform_3(%arg0: i32, %arg1: i32) -> (i32, i32) {
    %c0_i32 = arith.constant 0 : i32
    return %arg0, %arg1 : i32, i32
  }
  func.func @transform_4(%arg0: i32, %arg1: i32) -> (i32, i32) {
    %c0_i32 = arith.constant 0 : i32
    return %arg0, %arg1 : i32, i32
  }
}

module attributes {stable_mosaic.version = 11 : i64} {
  func.func @_fused_matmul_kernel(%arg0: i32, %arg1: i32, %arg2: memref<40x32xf32, #tpu.memory_space<vmem>>, %arg3: memref<1x32xf32, #tpu.memory_space<vmem>>, %arg4: memref<1x32xf32, #tpu.memory_space<vmem>>, %arg5: memref<32x128xf32, #tpu.memory_space<vmem>>, %arg6: memref<1x128xf32, #tpu.memory_space<vmem>>, %arg7: memref<40x128xf32, #tpu.memory_space<vmem>>, %arg8: memref<40x32xf32, #tpu.memory_space<vmem>>) attributes {dimension_semantics = [#tpu.dimension_semantics<parallel>, #tpu.dimension_semantics<arbitrary>], iteration_bounds = array<i64: 1, 1>, scalar_prefetch = 0 : i64, scratch_operands = 1 : i64, tpu.core_type = #tpu.core_type<tc>, window_params = [{transform_indices = @transform_0, window_bounds = array<i64: 40, 32>}, {pipeline_mode = #tpu.pipeline_mode<synchronous>, transform_indices = @transform_1, window_bounds = array<i64: 1, 32>}, {pipeline_mode = #tpu.pipeline_mode<synchronous>, transform_indices = @transform_2, window_bounds = array<i64: 1, 32>}, {transform_indices = @transform_3, window_bounds = array<i64: 32, 128>}, {transform_indices = @transform_4, window_bounds = array<i64: 1, 128>}, {transform_indices = @transform_5, window_bounds = array<i64: 40, 128>}]} {
    %c0_i32 = arith.constant 0 : i32
    %0 = arith.cmpi eq, %arg1, %c0_i32 : i32
    %1 = arith.extui %0 : i1 to i32
    %c0_i32_0 = arith.constant 0 : i32
    %2 = arith.cmpi ne, %1, %c0_i32_0 : i32
    scf.if %2 {
      %c0_12 = arith.constant 0 : index
      %c0_13 = arith.constant 0 : index
      %23 = vector.load %arg2[%c0_12, %c0_13] : memref<40x32xf32, #tpu.memory_space<vmem>>, vector<40x32xf32>
      %cst_14 = arith.constant dense<0.000000e+00> : vector<40xf32>
      %24 = vector.multi_reduction <add>, %23, %cst_14 [1] : vector<40x32xf32> to vector<40xf32>
      %25 = vector.shape_cast %24 : vector<40xf32> to vector<40x1xf32>
      %cst_15 = arith.constant 3.200000e+01 : f32
      %26 = vector.broadcast %cst_15 : f32 to vector<40x1xf32>
      %27 = arith.divf %25, %26 : vector<40x1xf32>
      %28 = vector.broadcast %27 : vector<40x1xf32> to vector<40x32xf32>
      %29 = arith.subf %23, %28 : vector<40x32xf32>
      %30 = arith.mulf %29, %29 : vector<40x32xf32>
      %cst_16 = arith.constant dense<0.000000e+00> : vector<40xf32>
      %31 = vector.multi_reduction <add>, %30, %cst_16 [1] : vector<40x32xf32> to vector<40xf32>
      %32 = vector.shape_cast %31 : vector<40xf32> to vector<40x1xf32>
      %cst_17 = arith.constant 3.200000e+01 : f32
      %33 = vector.broadcast %cst_17 : f32 to vector<40x1xf32>
      %34 = arith.divf %32, %33 : vector<40x1xf32>
      %35 = vector.broadcast %27 : vector<40x1xf32> to vector<40x32xf32>
      %36 = arith.subf %23, %35 : vector<40x32xf32>
      %cst_18 = arith.constant 9.99999974E-6 : f32
      %37 = vector.broadcast %cst_18 : f32 to vector<40x1xf32>
      %38 = arith.addf %34, %37 : vector<40x1xf32>
      %39 = math.rsqrt %38 : vector<40x1xf32>
      %40 = vector.broadcast %39 : vector<40x1xf32> to vector<40x32xf32>
      %41 = arith.mulf %36, %40 : vector<40x32xf32>
      %c0_19 = arith.constant 0 : index
      %c0_20 = arith.constant 0 : index
      %42 = vector.load %arg3[%c0_19, %c0_20] : memref<1x32xf32, #tpu.memory_space<vmem>>, vector<1x32xf32>
      %43 = vector.broadcast %42 : vector<1x32xf32> to vector<40x32xf32>
      %44 = arith.mulf %41, %43 : vector<40x32xf32>
      %c0_21 = arith.constant 0 : index
      %c0_22 = arith.constant 0 : index
      %45 = vector.load %arg4[%c0_21, %c0_22] : memref<1x32xf32, #tpu.memory_space<vmem>>, vector<1x32xf32>
      %46 = vector.broadcast %45 : vector<1x32xf32> to vector<40x32xf32>
      %47 = arith.addf %44, %46 : vector<40x32xf32>
      %c0_23 = arith.constant 0 : index
      %c0_24 = arith.constant 0 : index
      %48 = vector.load %arg8[%c0_23, %c0_24] : memref<40x32xf32, #tpu.memory_space<vmem>>, vector<40x32xf32>
      tpu.vector_store %arg8[%c0_23, %c0_24], %47 {strides = array<i32>} : memref<40x32xf32, #tpu.memory_space<vmem>>, vector<40x32xf32>,
    } else {
    }
    %c0 = arith.constant 0 : index
    %c0_1 = arith.constant 0 : index
    %3 = vector.load %arg8[%c0, %c0_1] : memref<40x32xf32, #tpu.memory_space<vmem>>, vector<40x32xf32>
    %c0_2 = arith.constant 0 : index
    %c0_3 = arith.constant 0 : index
    %4 = vector.load %arg5[%c0_2, %c0_3] : memref<32x128xf32, #tpu.memory_space<vmem>>, vector<32x128xf32>
    %cst = arith.constant dense<0.000000e+00> : vector<40x128xf32>
    %5 = tpu.matmul %3, %4, %cst {dimension_numbers = #tpu.dot_dimension_numbers<[1], [0], [0], [1], [0, 0, 1, 1], [], []>} : vector<40x32xf32>, vector<32x128xf32>, vector<40x128xf32> -> vector<40x128xf32>
    %c0_4 = arith.constant 0 : index
    %c0_5 = arith.constant 0 : index
    %6 = vector.load %arg6[%c0_4, %c0_5] : memref<1x128xf32, #tpu.memory_space<vmem>>, vector<1x128xf32>
    %7 = vector.broadcast %6 : vector<1x128xf32> to vector<40x128xf32>
    %8 = arith.addf %5, %7 : vector<40x128xf32>
    %cst_6 = arith.constant 5.000000e-01 : f32
    %9 = vector.broadcast %cst_6 : f32 to vector<40x128xf32>
    %10 = arith.mulf %9, %8 : vector<40x128xf32>
    %cst_7 = arith.constant 4.471500e-02 : f32
    %11 = vector.broadcast %cst_7 : f32 to vector<40x128xf32>
    %12 = arith.mulf %11, %8 : vector<40x128xf32>
    %13 = arith.mulf %12, %8 : vector<40x128xf32>
    %14 = arith.mulf %13, %8 : vector<40x128xf32>
    %15 = arith.addf %8, %14 : vector<40x128xf32>
    %cst_8 = arith.constant 0.797884583 : f32
    %16 = vector.broadcast %cst_8 : f32 to vector<40x128xf32>
    %17 = arith.mulf %16, %15 : vector<40x128xf32>
    %18 = math.tanh %17 : vector<40x128xf32>
    %cst_9 = arith.constant 1.000000e+00 : f32
    %19 = vector.broadcast %cst_9 : f32 to vector<40x128xf32>
    %20 = arith.addf %19, %18 : vector<40x128xf32>
    %21 = arith.mulf %10, %20 : vector<40x128xf32>
    %c0_10 = arith.constant 0 : index
    %c0_11 = arith.constant 0 : index
    %22 = vector.load %arg7[%c0_10, %c0_11] : memref<40x128xf32, #tpu.memory_space<vmem>>, vector<40x128xf32>
    tpu.vector_store %arg7[%c0_10, %c0_11], %21 {strides = array<i32>} : memref<40x128xf32, #tpu.memory_space<vmem>>, vector<40x128xf32>,
    return
  }
  func.func @transform_0(%arg0: i32, %arg1: i32) -> (i32, i32) {
    %c0_i32 = arith.constant 0 : i32
    %c0_i32_0 = arith.constant 0 : i32
    return %arg0, %c0_i32 : i32, i32
  }
  func.func @transform_1(%arg0: i32, %arg1: i32) -> (i32, i32) {
    %c0_i32 = arith.constant 0 : i32
    %c0_i32_0 = arith.constant 0 : i32
    %c0_i32_1 = arith.constant 0 : i32
    return %c0_i32, %c0_i32_0 : i32, i32
  }
  func.func @transform_2(%arg0: i32, %arg1: i32) -> (i32, i32) {
    %c0_i32 = arith.constant 0 : i32
    %c0_i32_0 = arith.constant 0 : i32
    %c0_i32_1 = arith.constant 0 : i32
    return %c0_i32, %c0_i32_0 : i32, i32
  }
  func.func @transform_3(%arg0: i32, %arg1: i32) -> (i32, i32) {
    %c0_i32 = arith.constant 0 : i32
    %c0_i32_0 = arith.constant 0 : i32
    return %c0_i32, %arg1 : i32, i32
  }
  func.func @transform_4(%arg0: i32, %arg1: i32) -> (i32, i32) {
    %c0_i32 = arith.constant 0 : i32
    %c0_i32_0 = arith.constant 0 : i32
    return %c0_i32, %arg1 : i32, i32
  }
  func.func @transform_5(%arg0: i32, %arg1: i32) -> (i32, i32) {
    %c0_i32 = arith.constant 0 : i32
    return %arg0, %arg1 : i32, i32
  }
}

module attributes {stable_mosaic.version = 11 : i64} {
  func.func @_fused_matmul_kernel(%arg0: i32, %arg1: i32, %arg2: memref<40x64xf32, #tpu.memory_space<vmem>>, %arg3: memref<64x128xf32, #tpu.memory_space<vmem>>, %arg4: memref<1x128xf32, #tpu.memory_space<vmem>>, %arg5: memref<40x128xf32, #tpu.memory_space<vmem>>, %arg6: memref<40x128xf32, #tpu.memory_space<vmem>>) attributes {dimension_semantics = [#tpu.dimension_semantics<parallel>, #tpu.dimension_semantics<parallel>], iteration_bounds = array<i64: 1, 1>, scalar_prefetch = 0 : i64, scratch_operands = 0 : i64, tpu.core_type = #tpu.core_type<tc>, window_params = [{transform_indices = @transform_0, window_bounds = array<i64: 40, 64>}, {transform_indices = @transform_1, window_bounds = array<i64: 64, 128>}, {transform_indices = @transform_2, window_bounds = array<i64: 1, 128>}, {transform_indices = @transform_3, window_bounds = array<i64: 40, 128>}, {transform_indices = @transform_4, window_bounds = array<i64: 40, 128>}]} {
    %c0 = arith.constant 0 : index
    %c0_0 = arith.constant 0 : index
    %0 = vector.load %arg2[%c0, %c0_0] : memref<40x64xf32, #tpu.memory_space<vmem>>, vector<40x64xf32>
    %c0_1 = arith.constant 0 : index
    %c0_2 = arith.constant 0 : index
    %1 = vector.load %arg3[%c0_1, %c0_2] : memref<64x128xf32, #tpu.memory_space<vmem>>, vector<64x128xf32>
    %cst = arith.constant dense<0.000000e+00> : vector<40x128xf32>
    %2 = tpu.matmul %0, %1, %cst {dimension_numbers = #tpu.dot_dimension_numbers<[1], [0], [0], [1], [0, 0, 1, 1], [], []>} : vector<40x64xf32>, vector<64x128xf32>, vector<40x128xf32> -> vector<40x128xf32>
    %c0_3 = arith.constant 0 : index
    %c0_4 = arith.constant 0 : index
    %3 = vector.load %arg4[%c0_3, %c0_4] : memref<1x128xf32, #tpu.memory_space<vmem>>, vector<1x128xf32>
    %4 = vector.broadcast %3 : vector<1x128xf32> to vector<40x128xf32>
    %5 = arith.addf %2, %4 : vector<40x128xf32>
    %c0_5 = arith.constant 0 : index
    %c0_6 = arith.constant 0 : index
    %6 = vector.load %arg5[%c0_5, %c0_6] : memref<40x128xf32, #tpu.memory_space<vmem>>, vector<40x128xf32>
    %7 = arith.addf %5, %6 : vector<40x128xf32>
    %c0_7 = arith.constant 0 : index
    %c0_8 = arith.constant 0 : index
    %8 = vector.load %arg6[%c0_7, %c0_8] : memref<40x128xf32, #tpu.memory_space<vmem>>, vector<40x128xf32>
    tpu.vector_store %arg6[%c0_7, %c0_8], %7 {strides = array<i32>} : memref<40x128xf32, #tpu.memory_space<vmem>>, vector<40x128xf32>,
    return
  }
  func.func @transform_0(%arg0: i32, %arg1: i32) -> (i32, i32) {
    %c0_i32 = arith.constant 0 : i32
    %c0_i32_0 = arith.constant 0 : i32
    return %arg0, %c0_i32 : i32, i32
  }
  func.func @transform_1(%arg0: i32, %arg1: i32) -> (i32, i32) {
    %c0_i32 = arith.constant 0 : i32
    %c0_i32_0 = arith.constant 0 : i32
    return %c0_i32, %arg1 : i32, i32
  }
  func.func @transform_2(%arg0: i32, %arg1: i32) -> (i32, i32) {
    %c0_i32 = arith.constant 0 : i32
    %c0_i32_0 = arith.constant 0 : i32
    return %c0_i32, %arg1 : i32, i32
  }
  func.func @transform_3(%arg0: i32, %arg1: i32) -> (i32, i32) {
    %c0_i32 = arith.constant 0 : i32
    return %arg0, %arg1 : i32, i32
  }
  func.func @transform_4(%arg0: i32, %arg1: i32) -> (i32, i32) {
    %c0_i32 = arith.constant 0 : i32
    return %arg0, %arg1 : i32, i32
  }
}

module attributes {stable_mosaic.version = 11 : i64} {
  func.func @_fused_matmul_kernel(%arg0: i32, %arg1: i32, %arg2: memref<8x32xf32, #tpu.memory_space<vmem>>, %arg3: memref<1x32xf32, #tpu.memory_space<vmem>>, %arg4: memref<1x32xf32, #tpu.memory_space<vmem>>, %arg5: memref<32x128xf32, #tpu.memory_space<vmem>>, %arg6: memref<1x128xf32, #tpu.memory_space<vmem>>, %arg7: memref<8x128xf32, #tpu.memory_space<vmem>>, %arg8: memref<8x32xf32, #tpu.memory_space<vmem>>) attributes {dimension_semantics = [#tpu.dimension_semantics<parallel>, #tpu.dimension_semantics<arbitrary>], iteration_bounds = array<i64: 1, 1>, scalar_prefetch = 0 : i64, scratch_operands = 1 : i64, tpu.core_type = #tpu.core_type<tc>, window_params = [{transform_indices = @transform_0, window_bounds = array<i64: 8, 32>}, {pipeline_mode = #tpu.pipeline_mode<synchronous>, transform_indices = @transform_1, window_bounds = array<i64: 1, 32>}, {pipeline_mode = #tpu.pipeline_mode<synchronous>, transform_indices = @transform_2, window_bounds = array<i64: 1, 32>}, {transform_indices = @transform_3, window_bounds = array<i64: 32, 128>}, {transform_indices = @transform_4, window_bounds = array<i64: 1, 128>}, {transform_indices = @transform_5, window_bounds = array<i64: 8, 128>}]} {
    %c0_i32 = arith.constant 0 : i32
    %0 = arith.cmpi eq, %arg1, %c0_i32 : i32
    %1 = arith.extui %0 : i1 to i32
    %c0_i32_0 = arith.constant 0 : i32
    %2 = arith.cmpi ne, %1, %c0_i32_0 : i32
    scf.if %2 {
      %c0_8 = arith.constant 0 : index
      %c0_9 = arith.constant 0 : index
      %10 = vector.load %arg2[%c0_8, %c0_9] : memref<8x32xf32, #tpu.memory_space<vmem>>, vector<8x32xf32>
      %cst_10 = arith.constant dense<0.000000e+00> : vector<8xf32>
      %11 = vector.multi_reduction <add>, %10, %cst_10 [1] : vector<8x32xf32> to vector<8xf32>
      %12 = vector.shape_cast %11 : vector<8xf32> to vector<8x1xf32>
      %cst_11 = arith.constant 3.200000e+01 : f32
      %13 = vector.broadcast %cst_11 : f32 to vector<8x1xf32>
      %14 = arith.divf %12, %13 : vector<8x1xf32>
      %15 = vector.broadcast %14 : vector<8x1xf32> to vector<8x32xf32>
      %16 = arith.subf %10, %15 : vector<8x32xf32>
      %17 = arith.mulf %16, %16 : vector<8x32xf32>
      %cst_12 = arith.constant dense<0.000000e+00> : vector<8xf32>
      %18 = vector.multi_reduction <add>, %17, %cst_12 [1] : vector<8x32xf32> to vector<8xf32>
      %19 = vector.shape_cast %18 : vector<8xf32> to vector<8x1xf32>
      %cst_13 = arith.constant 3.200000e+01 : f32
      %20 = vector.broadcast %cst_13 : f32 to vector<8x1xf32>
      %21 = arith.divf %19, %20 : vector<8x1xf32>
      %22 = vector.broadcast %14 : vector<8x1xf32> to vector<8x32xf32>
      %23 = arith.subf %10, %22 : vector<8x32xf32>
      %cst_14 = arith.constant 9.99999974E-6 : f32
      %24 = vector.broadcast %cst_14 : f32 to vector<8x1xf32>
      %25 = arith.addf %21, %24 : vector<8x1xf32>
      %26 = math.rsqrt %25 : vector<8x1xf32>
      %27 = vector.broadcast %26 : vector<8x1xf32> to vector<8x32xf32>
      %28 = arith.mulf %23, %27 : vector<8x32xf32>
      %c0_15 = arith.constant 0 : index
      %c0_16 = arith.constant 0 : index
      %29 = vector.load %arg3[%c0_15, %c0_16] : memref<1x32xf32, #tpu.memory_space<vmem>>, vector<1x32xf32>
      %30 = vector.broadcast %29 : vector<1x32xf32> to vector<8x32xf32>
      %31 = arith.mulf %28, %30 : vector<8x32xf32>
      %c0_17 = arith.constant 0 : index
      %c0_18 = arith.constant 0 : index
      %32 = vector.load %arg4[%c0_17, %c0_18] : memref<1x32xf32, #tpu.memory_space<vmem>>, vector<1x32xf32>
      %33 = vector.broadcast %32 : vector<1x32xf32> to vector<8x32xf32>
      %34 = arith.addf %31, %33 : vector<8x32xf32>
      %c0_19 = arith.constant 0 : index
      %c0_20 = arith.constant 0 : index
      %35 = vector.load %arg8[%c0_19, %c0_20] : memref<8x32xf32, #tpu.memory_space<vmem>>, vector<8x32xf32>
      tpu.vector_store %arg8[%c0_19, %c0_20], %34 {strides = array<i32>} : memref<8x32xf32, #tpu.memory_space<vmem>>, vector<8x32xf32>,
    } else {
    }
    %c0 = arith.constant 0 : index
    %c0_1 = arith.constant 0 : index
    %3 = vector.load %arg8[%c0, %c0_1] : memref<8x32xf32, #tpu.memory_space<vmem>>, vector<8x32xf32>
    %c0_2 = arith.constant 0 : index
    %c0_3 = arith.constant 0 : index
    %4 = vector.load %arg5[%c0_2, %c0_3] : memref<32x128xf32, #tpu.memory_space<vmem>>, vector<32x128xf32>
    %cst = arith.constant dense<0.000000e+00> : vector<8x128xf32>
    %5 = tpu.matmul %3, %4, %cst {dimension_numbers = #tpu.dot_dimension_numbers<[1], [0], [0], [1], [0, 0, 1, 1], [], []>} : vector<8x32xf32>, vector<32x128xf32>, vector<8x128xf32> -> vector<8x128xf32>
    %c0_4 = arith.constant 0 : index
    %c0_5 = arith.constant 0 : index
    %6 = vector.load %arg6[%c0_4, %c0_5] : memref<1x128xf32, #tpu.memory_space<vmem>>, vector<1x128xf32>
    %7 = vector.broadcast %6 : vector<1x128xf32> to vector<8x128xf32>
    %8 = arith.addf %5, %7 : vector<8x128xf32>
    %c0_6 = arith.constant 0 : index
    %c0_7 = arith.constant 0 : index
    %9 = vector.load %arg7[%c0_6, %c0_7] : memref<8x128xf32, #tpu.memory_space<vmem>>, vector<8x128xf32>
    tpu.vector_store %arg7[%c0_6, %c0_7], %8 {strides = array<i32>} : memref<8x128xf32, #tpu.memory_space<vmem>>, vector<8x128xf32>,
    return
  }
  func.func @transform_0(%arg0: i32, %arg1: i32) -> (i32, i32) {
    %c0_i32 = arith.constant 0 : i32
    %c0_i32_0 = arith.constant 0 : i32
    return %arg0, %c0_i32 : i32, i32
  }
  func.func @transform_1(%arg0: i32, %arg1: i32) -> (i32, i32) {
    %c0_i32 = arith.constant 0 : i32
    %c0_i32_0 = arith.constant 0 : i32
    %c0_i32_1 = arith.constant 0 : i32
    return %c0_i32, %c0_i32_0 : i32, i32
  }
  func.func @transform_2(%arg0: i32, %arg1: i32) -> (i32, i32) {
    %c0_i32 = arith.constant 0 : i32
    %c0_i32_0 = arith.constant 0 : i32
    %c0_i32_1 = arith.constant 0 : i32
    return %c0_i32, %c0_i32_0 : i32, i32
  }
  func.func @transform_3(%arg0: i32, %arg1: i32) -> (i32, i32) {
    %c0_i32 = arith.constant 0 : i32
    %c0_i32_0 = arith.constant 0 : i32
    return %c0_i32, %arg1 : i32, i32
  }
  func.func @transform_4(%arg0: i32, %arg1: i32) -> (i32, i32) {
    %c0_i32 = arith.constant 0 : i32
    %c0_i32_0 = arith.constant 0 : i32
    return %c0_i32, %arg1 : i32, i32
  }
  func.func @transform_5(%arg0: i32, %arg1: i32) -> (i32, i32) {
    %c0_i32 = arith.constant 0 : i32
    return %arg0, %arg1 : i32, i32
  }
}

</mosaic_0001>

<bundles_post_ra>
// kernel: _lambda_.14
= control target key start
LH: loop header
LB: loop body
LE: loop exit
PB: predicated region body
PF: predicated region fallthrough
CT: control target
= control target key end

     0   :  { %s854_s12 = smov 0   ;;  %s856_s13 = smov 0   ;;  %s952_s0 = inlined_call_operand.vmem [shape: f32[3,2,4,17,8], index: 0, kind: input, shape index: {}, may-alias: {0,1,2}]   ;;  %s953_s1 = inlined_call_operand.vmem [shape: f32[3,2,4,17,8], index: 1, kind: input, shape index: {}, may-alias: {0,1,2}]   ;;  %s954_s2 = inlined_call_operand.vmem [shape: f32[3,2,4,17,8], index: 2, kind: input, shape index: {}, may-alias: {0,1,2}]   ;;  %s955_s3 = inlined_call_operand.vmem [shape: f32[2,4,17,8], index: 3, kind: output, shape index: {}]  }
   0x1   :  { %s858_s14 = smov 0   ;;  %s860_s15 = smov 0  }
   0x2   :  { %s862_s16 = smov 0  }
   0x3 LB: > { %s22_s17 = sadd.s32 1, %s822_s14  ;;  %s25_s18 = sadd.s32 1, %s826_s15  ;;  %s830_s16 = sphi %s862_s16, %s13_s16   ;;  %s826_s15 = sphi %s860_s15, %s959_s15   ;;  %s822_s14 = sphi %s858_s14, %s958_s14   ;;  %s818_s13 = sphi %s856_s13, %s957_s13   ;;  %s814_s12 = sphi %s854_s12, %s956_s12  }
   0x4   : > { %p23_p0 = scmp.ge.s32.totalorder %s22_s17, 4  ;;  %p671_p1 = scmp.ge.s32.totalorder %s830_s16, 1 }
   0x5   : > { %p191_p2 = scmp.lt.s32.totalorder %s830_s16, 9 }
   0x6   : > { %s961_s17 = smov (%p23_p0, %s22_s17), 0  ;;  %s963_s18 = smov (!%p23_p0, %s25_s18), %s826_s15 }
   0x7   : > { %p192_p3 = pnand %p671_p1, %p191_p2  ;;  %p27_p4 = scmp.ge.s32.totalorder %s963_s18, 2 }
   0x8   : > { %p243_p5 = scmp.lt.s32.totalorder (!%p192_p3), %s818_s13, 1  ;;  %p245_p6 = scmp.lt.s32.totalorder (!%p192_p3), %s814_s12, 3 }
   0x9   : > { %s965_s18 = smov (%p27_p4, %s963_s18), 0  ;;  %195 = sbr.rel (%p192_p3) target bundleno = 741 (0x2e5), region = 32 }
   0xe   : > { %v832_v0 = vmov 0.0   ;;  %vm833_vm0 = vmmov 0   ;;  %s967_s13 = smov (!%p243_p5, %s818_s13), 1  ;;  %s969_s12 = smov (!%p245_p6, %s814_s12), 3  ;;  %vm290_vm1 = vcmask 64512   ;;  %vm389_vm2 = vcmask 138240  }
   0xf   : > { %706 = vmatprep.subr.mxu0 %v832_v0  ;;  %712 = vmatprep.mubr.msk.f32.mxu0 %vm833_vm0, %v832_v0  ;;  %s737_s19 = smul.u32 12, %s967_s13  ;;  %vm396_vm3 = vcmask 131072   ;;  %vm436_vm4 = vcmask 1040384   ;;  %vm522_vm5 = vcmask 57344  }
  0x10   : > { %721 = vmatprep.subr.mxu1 %v832_v0  ;;  %727 = vmatprep.mubr.msk.f32.mxu1 %vm833_vm0, %v832_v0  ;;  %s736_s20 = smul.u32 3, %s969_s12 }
  0x12   : > { %s249_s21 = sadd.s32 %s737_s19, %s736_s20 }
  0x13   : > { %s890_s22 = sshll.u32 %s249_s21, 3 }
  0x14   : > { %s601_s25 = scalar_lea.vmem %s953_s1, %s890_s22  ;;  %s251_s28 = scalar_lea.vmem %s952_s0, %s890_s22 }
  0x15   : > { %v678_v1 = vld [vmem:[%s601_s25 + $0xd0] sm:$0x1]  ;;  %v677_v2 = vld [vmem:[%s601_s25 + $0xc8] sm:$0xff]  ;;  %v281_v3 = vld [vmem:[%s251_s28] sm:$0xff]  ;;  %s607_s4 = scalar_lea.vmem %s954_s2, %s890_s22  ;;  %s280_s7 = scalar_lea.vmem %s955_s3, %s890_s22 }
  0x16   : > { %707 = vmatpush3.xpose.msk.msra.mxu0 %vm290_vm1, %v678_v1  ;;  %v676_v4 = vld [vmem:[%s601_s25 + $0xc0] sm:$0xff]  ;;  %v284_v5 = vmul.f32 0.35355338, %v281_v3  ;;  %v282_v6 = vld [vmem:[%s251_s28 + $0x8] sm:$0xff]  ;;  %v283_v8 = vld [vmem:[%s251_s28 + $0x10] sm:$0x1] }
  0x17   : > { %708 = vmatprep.subr.mxu0 %v832_v0  ;;  %v285_v7 = vmul.f32 0.35355338, %v282_v6  ;;  %v286_v9 = vmul.f32 0.35355338, %v283_v8  ;;  %v687_v34 = vld [vmem:[%s607_s4 + $0x190] sm:$0x1] }
  0x18   : > { %v686_v35 = vld [vmem:[%s607_s4 + $0x188] sm:$0xff]  ;;  %722 = vmatpush3.msk.msra.mxu1 %vm436_vm4, %v687_v34  ;;  %v685_v36 = vld [vmem:[%s607_s4 + $0x180] sm:$0xff] }
  0x19   : > { %723 = vmatprep.subr.mxu1 %v832_v0 }
  0x1a   : > { %709 = vmatpush3.xpose.msk.msra.mxu0 %vm290_vm1, %v677_v2  ;;  %724 = vmatpush3.msra.mxu1 %v686_v35 }
  0x1b   : > { %710 = vmatprep.subr.mxu0 %v832_v0  ;;  %725 = vmatprep.subr.mxu1 %v832_v0 }
  0x1c   : > { %726 = vmatpush3.msra.mxu1 %v685_v36 }
  0x1e   : > { %711 = vmatpush3.xpose.msk.msra.mxu0 %vm290_vm1, %v676_v4 }
  0x21   : > { %713 = vmatmul.mubr.msk.f32.vlgmr.msra.gmra.mxu0 %vm290_vm1, %v284_v5 }
  0x22   : > { %715 = vmatprep.mubr.msk.f32.mxu0 %vm833_vm0, %v832_v0 }
  0x25   : > { %716 = vmatmul.mubr.msk.f32.gmra.mxu0 %vm290_vm1, %v285_v7 }
  0x26   : > { %718 = vmatprep.mubr.msk.f32.mxu0 %vm833_vm0, %v832_v0 }
  0x29   : > { %719 = vmatmul.mubr.msk.f32.gmra.mxu0 %vm290_vm1, %v286_v9 }
  0xe1   : > { %v375_v10 = vpop.f32.mrf.mxu0 }
  0xe2   : > { %v390_v11 = vsel %vm389_vm2, %v375_v10, -inf }
  0xe3   : > { %391 = vmax.xlane.f32.xlu0 %v390_v11  ;;  %v714_v12 = vpop.f32.mrf.mxu0 }
  0xe5   : > { %v380_v13 = vpop.f32.mrf.mxu0 }
  0xe6   : > { %v393_v14 = vsel %vm389_vm2, %v380_v13, -inf }
  0xe7   : > { %394 = vmax.xlane.f32.xlu0 %v393_v14  ;;  %v717_v15 = vpop.f32.mrf.mxu0 }
  0xe9   : > { %v385_v16 = vpop.f32.mrf.mxu0 }
  0xea   : > { %v397_v17 = vsel %vm396_vm3, %v385_v16, -inf }
  0xeb   : > { %398 = vmax.xlane.f32.xlu1 %v397_v17  ;;  %v720_v18 = vpop.f32.mrf.mxu0 }
 0x16c   : > { %v392_v19 = vpop.xlane.xlu0 %391 }
 0x16d   : > { %v400_v20 = vsub.f32 %v375_v10, %v392_v19 }
 0x16f   : > { %v403_v21 = vmul.f32 1.442695, %v400_v20 }
 0x170   : > { %v395_v22 = vpop.xlane.xlu0 %394 }
 0x171   : > { %780 = vpow2.f32 %v403_v21  ;;  %v401_v23 = vsub.f32 %v380_v13, %v395_v22 }
 0x173   : > { %v405_v24 = vmul.f32 1.442695, %v401_v23 }
 0x174   : > { %v399_v25 = vpop.xlane.xlu1 %398 }
 0x175   : > { %782 = vpow2.f32 %v405_v24  ;;  %v402_v26 = vsub.f32 %v385_v16, %v399_v25 }
 0x177   : > { %v407_v27 = vmul.f32 1.442695, %v402_v26 }
 0x179   : > { %784 = vpow2.f32 %v407_v27 }
 0x17e   : > { %v781_v28 = vpop.eup %780 }
 0x17f   : > { %v409_v29 = vsel %vm389_vm2, %v781_v28, 0.0 }
 0x180   : > { %410 = vadd.xlane.f32.xlu1 %v409_v29 }
 0x182   : > { %v783_v30 = vpop.eup %782 }
 0x183   : > { %v412_v31 = vsel %vm389_vm2, %v783_v30, 0.0 }
 0x184   : > { %413 = vadd.xlane.f32.xlu0 %v412_v31 }
 0x186   : > { %v785_v32 = vpop.eup %784 }
 0x187   : > { %v415_v33 = vsel %vm396_vm3, %v785_v32, 0.0 }
 0x188   : > { %416 = vadd.xlane.f32.xlu1 %v415_v33 }
 0x209   : > { %v411_v37 = vpop.xlane.xlu1 %410 }
 0x20a   : > { %786 = vrcp.f32 %v411_v37 }
 0x20d   : > { %v414_v38 = vpop.xlane.xlu0 %413 }
 0x20e   : > { %788 = vrcp.f32 %v414_v38 }
 0x211   : > { %v417_v39 = vpop.xlane.xlu1 %416 }
 0x212   : > { %790 = vrcp.f32 %v417_v39 }
 0x217   : > { %v787_v40 = vpop.eup %786 }
 0x218   : > { %v421_v41 = vmul.f32 %v787_v40, %v781_v28 }
 0x21a   : > { %728 = vmatmul.mubr.msk.f32.vlgmr.msra.gmra.mxu1 %vm389_vm2, %v421_v41 }
 0x21b   : > { %v789_v42 = vpop.eup %788  ;;  %730 = vmatprep.mubr.msk.f32.mxu1 %vm833_vm0, %v832_v0 }
 0x21c   : > { %v422_v43 = vmul.f32 %v789_v42, %v783_v30 }
 0x21e   : > { %731 = vmatmul.mubr.msk.f32.gmra.mxu1 %vm389_vm2, %v422_v43 }
 0x21f   : > { %v791_v44 = vpop.eup %790  ;;  %733 = vmatprep.mubr.msk.f32.mxu1 %vm833_vm0, %v832_v0 }
 0x220   : > { %v423_v45 = vmul.f32 %v791_v44, %v785_v32 }
 0x222   : > { %734 = vmatmul.mubr.msk.f32.gmra.mxu1 %vm389_vm2, %v423_v45 }
 0x2da   : > { %v506_v46 = vpop.f32.mrf.mxu1 }
 0x2db   : > { %520 = vst.msk [vmem:[%s280_s7] sm:$0xff] %vm290_vm1, %v506_v46 }
 0x2dc   : > { %v729_v47 = vpop.f32.mrf.mxu1 }
 0x2de   : > { %v511_v48 = vpop.f32.mrf.mxu1 }
 0x2df   : > { %521 = vst.msk [vmem:[%s280_s7 + $0x8] sm:$0xff] %vm290_vm1, %v511_v48 }
 0x2e0   : > { %v732_v49 = vpop.f32.mrf.mxu1 }
 0x2e2   : > { %v516_v50 = vpop.f32.mrf.mxu1 }
 0x2e3   : > { %523 = vst.msk [vmem:[%s280_s7 + $0x10] sm:$0x1] %vm522_vm5, %v516_v50 }
 0x2e4   : > { %v735_v51 = vpop.f32.mrf.mxu1 }
 0x2e5 PF: > { %s13_s16 = sadd.s32 1, %s830_s16   ;;  %s956_s12 = smov %s822_s14 }
 0x2e6   : > { %p10_p7 = scmp.ge.s32.totalorder %s13_s16, 10   ;;  %s957_s13 = smov %s826_s15 }
 0x2e7   : > { %s958_s14 = smov %s961_s17  ;;  %s959_s15 = smov %s965_s18 }
 0x2e8   :  { %12 = sbr.rel (!%p10_p7) target bundleno = 3 (0x3), region = 68 }

// kernel: _lambda_.13
= control target key start
LH: loop header
LB: loop body
LE: loop exit
PB: predicated region body
PF: predicated region fallthrough
CT: control target
= control target key end

     0   :  { %vm29_vm0 = vcmask 261120   ;;  %v316_v35 = vmov 0.0   ;;  %vm317_vm1 = vmmov 0   ;;  %s462_s0 = inlined_call_operand.vmem [shape: f32[40,32], index: 0, kind: input, shape index: {}]   ;;  %s463_s3 = inlined_call_operand.vmem [shape: f32[32,128], index: 3, kind: input, shape index: {}]   ;;  %s464_s1 = inlined_call_operand.vmem [shape: f32[1,32], index: 1, kind: input, shape index: {}]   ;;  %s465_s2 = inlined_call_operand.vmem [shape: f32[1,32], index: 2, kind: input, shape index: {}]   ;;  %s466_s4 = inlined_call_operand.vmem [shape: f32[1,128], index: 4, kind: input, shape index: {}]   ;;  %s467_s5 = inlined_call_operand.vmem [shape: f32[40,128], index: 5, kind: output, shape index: {}]  }
   0x1   :  { %v24_v0 = vld [vmem:[%s462_s0] sm:$0xff]  ;;  %v27_v1 = vld [vmem:[%s462_s0 + $0x18] sm:$0xff]  ;;  %v25_v2 = vld [vmem:[%s462_s0 + $0x8] sm:$0xff]  ;;  %273 = vmatprep.subr.mxu0 %v316_v35  ;;  %296 = vmatprep.subr.mxu1 %v316_v35 }
   0x2   :  { %v30_v3 = vsel %vm29_vm0, %v24_v0, 0.0  ;;  %v39_v4 = vsel %vm29_vm0, %v27_v1, 0.0  ;;  %v26_v5 = vld [vmem:[%s462_s0 + $0x10] sm:$0xff]  ;;  %v33_v6 = vsel %vm29_vm0, %v25_v2, 0.0  ;;  %v28_v8 = vld [vmem:[%s462_s0 + $0x20] sm:$0xff]  ;;  %v133_v36 = vld [vmem:[%s463_s3 + $0x18] sm:$0xff]  ;;  %281 = vmatprep.mubr.msk.f32.mxu0 %vm317_vm1, %v316_v35  ;;  %290 = vmatprep.mubr.msk.f32.mxu1 %vm317_vm1, %v316_v35 }
   0x3   :  { %31 = vadd.xlane.f32.xlu0 %v30_v3  ;;  %40 = vadd.xlane.f32.xlu1 %v39_v4  ;;  %v36_v7 = vsel %vm29_vm0, %v26_v5, 0.0  ;;  %v42_v9 = vsel %vm29_vm0, %v28_v8, 0.0  ;;  %v132_v37 = vld [vmem:[%s463_s3 + $0x10] sm:$0xff]  ;;  %v131_v38 = vld [vmem:[%s463_s3 + $0x8] sm:$0xff]  ;;  %v130_v39 = vld [vmem:[%s463_s3] sm:$0xff] }
   0x4   :  { %274 = vmatpush3.msra.mxu0 %v133_v36  ;;  %300 = vmatpush3.msra.mxu1 %v133_v36  ;;  %v256_v56 = vld [vmem:[%s464_s1] ss:$0 sm:$0xff] }
   0x5   :  { %275 = vmatprep.subr.mxu0 %v316_v35  ;;  %297 = vmatprep.subr.mxu1 %v316_v35  ;;  %v257_v58 = vld [vmem:[%s465_s2] ss:$0 sm:$0xff] }
   0x6   :  { %276 = vmatpush3.msra.mxu0 %v132_v37  ;;  %301 = vmatpush3.msra.mxu1 %v132_v37 }
   0x7   :  { %34 = vadd.xlane.f32.xlu0 %v33_v6  ;;  %37 = vadd.xlane.f32.xlu1 %v36_v7 }
   0x8   :  { %277 = vmatprep.subr.mxu0 %v316_v35  ;;  %298 = vmatprep.subr.mxu1 %v316_v35 }
   0x9   :  { %278 = vmatpush3.msra.mxu0 %v131_v38  ;;  %302 = vmatpush3.msra.mxu1 %v131_v38 }
   0xa   :  { %279 = vmatprep.subr.mxu0 %v316_v35  ;;  %299 = vmatprep.subr.mxu1 %v316_v35 }
   0xb   :  { %43 = vadd.xlane.f32.xlu0 %v42_v9  ;;  %280 = vmatpush3.msra.mxu0 %v130_v39 }
   0xc   :  { %303 = vmatpush3.msra.mxu1 %v130_v39 }
  0x8c   :  { %v32_v10 = vpop.xlane.xlu0 %31  ;;  %v41_v11 = vpop.xlane.xlu1 %40 }
  0x8d   :  { %v46_v12 = vmul.f32 0.03125, %v32_v10  ;;  %v49_v13 = vmul.f32 0.03125, %v41_v11 }
  0x8f   :  { %v368_v14 = vsub.f32 %v24_v0, %v46_v12  ;;  %v370_v15 = vsub.f32 %v27_v1, %v49_v13 }
  0x90   :  { %v35_v16 = vpop.xlane.xlu0 %34  ;;  %v38_v17 = vpop.xlane.xlu1 %37 }
  0x91   :  { %v47_v18 = vmul.f32 0.03125, %v35_v16  ;;  %v48_v19 = vmul.f32 0.03125, %v38_v17  ;;  %v56_v20 = vmul.f32 %v368_v14, %v368_v14  ;;  %v59_v21 = vmul.f32 %v370_v15, %v370_v15 }
  0x93   :  { %v376_v22 = vsub.f32 %v25_v2, %v47_v18  ;;  %v378_v23 = vsub.f32 %v26_v5, %v48_v19  ;;  %v61_v24 = vsel %vm29_vm0, %v56_v20, 0.0  ;;  %v70_v27 = vsel %vm29_vm0, %v59_v21, 0.0  ;;  %v258_v18 = vld [vmem:[%s466_s4] ss:$0 sm:$0xff] }
  0x94   :  { %62 = vadd.xlane.f32.xlu1 %v61_v24  ;;  %v44_v25 = vpop.xlane.xlu0 %43 }
  0x95   :  { %v50_v26 = vmul.f32 0.03125, %v44_v25  ;;  %v57_v28 = vmul.f32 %v376_v22, %v376_v22  ;;  %v58_v29 = vmul.f32 %v378_v23, %v378_v23 }
  0x97   :  { %v386_v30 = vsub.f32 %v28_v8, %v50_v26  ;;  %v64_v31 = vsel %vm29_vm0, %v57_v28, 0.0  ;;  %v67_v32 = vsel %vm29_vm0, %v58_v29, 0.0 }
  0x98   :  { %71 = vadd.xlane.f32.xlu1 %v70_v27  ;;  %65 = vadd.xlane.f32.xlu0 %v64_v31 }
  0x99   :  { %v60_v33 = vmul.f32 %v386_v30, %v386_v30 }
  0x9b   :  { %v73_v34 = vsel %vm29_vm0, %v60_v33, 0.0 }
  0x9c   :  { %68 = vadd.xlane.f32.xlu0 %v67_v32  ;;  %74 = vadd.xlane.f32.xlu1 %v73_v34 }
 0x11d   :  { %v63_v40 = vpop.xlane.xlu1 %62 }
 0x11e   :  { %v76_v41 = vmul.f32 0.03125, %v63_v40 }
 0x120   :  { %v81_v42 = vadd.f32 1e-05, %v76_v41 }
 0x121   :  { %v72_v43 = vpop.xlane.xlu1 %71  ;;  %v66_v44 = vpop.xlane.xlu0 %65 }
 0x122   :  { %306 = vrsqrt.f32 %v81_v42  ;;  %v79_v45 = vmul.f32 0.03125, %v72_v43  ;;  %v77_v46 = vmul.f32 0.03125, %v66_v44 }
 0x124   :  { %v84_v47 = vadd.f32 1e-05, %v79_v45  ;;  %v82_v48 = vadd.f32 1e-05, %v77_v46 }
 0x125   :  { %v75_v49 = vpop.xlane.xlu1 %74  ;;  %v69_v50 = vpop.xlane.xlu0 %68 }
 0x126   :  { %308 = vrsqrt.f32 %v84_v47  ;;  %v80_v51 = vmul.f32 0.03125, %v75_v49  ;;  %v78_v52 = vmul.f32 0.03125, %v69_v50 }
 0x127   :  { %310 = vrsqrt.f32 %v82_v48 }
 0x128   :  { %v85_v53 = vadd.f32 1e-05, %v80_v51  ;;  %v83_v54 = vadd.f32 1e-05, %v78_v52 }
 0x12a   :  { %312 = vrsqrt.f32 %v85_v53 }
 0x12b   :  { %314 = vrsqrt.f32 %v83_v54 }
 0x12f   :  { %v307_v55 = vpop.eup %306 }
 0x130   :  { %v91_v57 = vmul.f32 %v307_v55, %v368_v14 }
 0x132   :  { %v103_v59 = vmul.f32 %v256_v56, %v91_v57 }
 0x133   :  { %v309_v60 = vpop.eup %308 }
 0x134   :  { %v311_v61 = vpop.eup %310  ;;  %v115_v62 = vadd.f32 %v257_v58, %v103_v59  ;;  %v94_v63 = vmul.f32 %v309_v60, %v370_v15 }
 0x135   :  { %v92_v0 = vmul.f32 %v311_v61, %v376_v22 }
 0x136   :  { %120 = vst.msk [vmem:[#allocation2] sm:$0xff] %vm29_vm0, %v115_v62  ;;  %v106_v1 = vmul.f32 %v256_v56, %v94_v63 }
 0x137   :  { %v313_v2 = vpop.eup %312  ;;  %v104_v3 = vmul.f32 %v256_v56, %v92_v0 }
 0x138   :  { %v315_v4 = vpop.eup %314  ;;  %v118_v5 = vadd.f32 %v257_v58, %v106_v1  ;;  %v95_v6 = vmul.f32 %v313_v2, %v386_v30 }
 0x139   :  { %v116_v7 = vadd.f32 %v257_v58, %v104_v3  ;;  %v93_v8 = vmul.f32 %v315_v4, %v378_v23 }
 0x13a   :  { %123 = vst.msk [vmem:[#allocation2 + $0x18] sm:$0xff] %vm29_vm0, %v118_v5  ;;  %v107_v9 = vmul.f32 %v256_v56, %v95_v6 }
 0x13b   :  { %121 = vst.msk [vmem:[#allocation2 + $0x8] sm:$0xff] %vm29_vm0, %v116_v7  ;;  %v105_v10 = vmul.f32 %v256_v56, %v93_v8 }
 0x13c   :  { %v119_v11 = vadd.f32 %v257_v58, %v107_v9 }
 0x13d   :  { %v117_v12 = vadd.f32 %v257_v58, %v105_v10  ;;  %v125_v13 = vld [vmem:[#allocation2] sm:$0xff] }
 0x13e   :  { %124 = vst.msk [vmem:[#allocation2 + $0x20] sm:$0xff] %vm29_vm0, %v119_v11  ;;  %282 = vmatmul.mubr.msk.f32.vlgmr.msra.gmra.mxu0 %vm29_vm0, %v125_v13 }
 0x13f   :  { %122 = vst.msk [vmem:[#allocation2 + $0x10] sm:$0xff] %vm29_vm0, %v117_v12  ;;  %284 = vmatprep.mubr.msk.f32.mxu0 %vm317_vm1, %v316_v35 }
 0x141   :  { %v128_v14 = vld [vmem:[#allocation2 + $0x18] sm:$0xff] }
 0x142   :  { %v126_v15 = vld [vmem:[#allocation2 + $0x8] sm:$0xff]  ;;  %291 = vmatmul.mubr.msk.f32.vlgmr.msra.gmra.mxu1 %vm29_vm0, %v128_v14 }
 0x143   :  { %285 = vmatmul.mubr.msk.f32.gmra.mxu0 %vm29_vm0, %v126_v15  ;;  %293 = vmatprep.mubr.msk.f32.mxu1 %vm317_vm1, %v316_v35 }
 0x144   :  { %287 = vmatprep.mubr.msk.f32.mxu0 %vm317_vm1, %v316_v35 }
 0x145   :  { %v129_v16 = vld [vmem:[#allocation2 + $0x20] sm:$0xff] }
 0x146   :  { %v127_v17 = vld [vmem:[#allocation2 + $0x10] sm:$0xff]  ;;  %294 = vmatmul.mubr.msk.f32.gmra.mxu1 %vm29_vm0, %v129_v16 }
 0x147   :  { %288 = vmatmul.mubr.msk.f32.gmra.mxu0 %vm29_vm0, %v127_v17 }
 0x1fe   :  { %v223_v19 = vpop.f32.mrf.mxu0 }
 0x1ff   :  { %v224_v20 = vadd.f32 %v258_v18, %v223_v19 }
 0x200   :  { %v283_v21 = vpop.f32.mrf.mxu0 }
 0x201   :  { %247 = vst [vmem:[%s467_s5] sm:$0xff] %v224_v20 }
 0x202   :  { %v238_v22 = vpop.f32.mrf.mxu1 }
 0x203   :  { %v228_v23 = vpop.f32.mrf.mxu0  ;;  %v239_v24 = vadd.f32 %v258_v18, %v238_v22 }
 0x204   :  { %v229_v25 = vadd.f32 %v258_v18, %v228_v23  ;;  %v292_v26 = vpop.f32.mrf.mxu1 }
 0x205   :  { %250 = vst [vmem:[%s467_s5 + $0x18] sm:$0xff] %v239_v24  ;;  %v286_v27 = vpop.f32.mrf.mxu0 }
 0x206   :  { %248 = vst [vmem:[%s467_s5 + $0x8] sm:$0xff] %v229_v25  ;;  %v243_v28 = vpop.f32.mrf.mxu1 }
 0x207   :  { %v233_v29 = vpop.f32.mrf.mxu0  ;;  %v244_v30 = vadd.f32 %v258_v18, %v243_v28 }
 0x208   :  { %v234_v31 = vadd.f32 %v258_v18, %v233_v29  ;;  %v295_v32 = vpop.f32.mrf.mxu1 }
 0x209   :  { %251 = vst [vmem:[%s467_s5 + $0x20] sm:$0xff] %v244_v30  ;;  %v289_v33 = vpop.f32.mrf.mxu0 }
 0x20a   :  { %249 = vst [vmem:[%s467_s5 + $0x10] sm:$0xff] %v234_v31 }

// kernel: _lambda_.12
= control target key start
LH: loop header
LB: loop body
LE: loop exit
PB: predicated region body
PF: predicated region fallthrough
CT: control target
= control target key end

     0   :  { %vm33_vm0 = vcmask 523264   ;;  %s265_s1 = inlined_call_operand.vmem [shape: f32[64,128], index: 1, kind: input, shape index: {}]   ;;  %s266_s0 = inlined_call_operand.vmem [shape: f32[32,64], index: 0, kind: input, shape index: {}]   ;;  %s267_s2 = inlined_call_operand.vmem [shape: f32[1,128], index: 2, kind: input, shape index: {}]   ;;  %s268_s3 = inlined_call_operand.vmem [shape: f32[32,128], index: 3, kind: output, shape index: {}]  }
   0x1   :  { %v25_v0 = vld [vmem:[%s265_s1 + $0x38] sm:$0xff]  ;;  %v24_v1 = vld [vmem:[%s265_s1 + $0x30] sm:$0xff]  ;;  %v23_v2 = vld [vmem:[%s265_s1 + $0x28] sm:$0xff] }
   0x2   :  { %156 = vmatprep.subr.mxu0 %v25_v0  ;;  %178 = vmatprep.subr.mxu1 %v25_v0  ;;  %v22_v3 = vld [vmem:[%s265_s1 + $0x20] sm:$0xff]  ;;  %v21_v4 = vld [vmem:[%s265_s1 + $0x18] sm:$0xff]  ;;  %v20_v5 = vld [vmem:[%s265_s1 + $0x10] sm:$0xff] }
   0x3   :  { %157 = vmatpush3.msra.mxu0 %v25_v0  ;;  %186 = vmatpush3.msra.mxu1 %v25_v0  ;;  %v19_v6 = vld [vmem:[%s265_s1 + $0x8] sm:$0xff]  ;;  %v18_v7 = vld [vmem:[%s265_s1] sm:$0xff]  ;;  %v16_v9 = vld [vmem:[%s266_s0 + $0x10] sm:$0xff] }
   0x4   :  { %158 = vmatprep.subr.mxu0 %v24_v1  ;;  %179 = vmatprep.subr.mxu1 %v24_v1  ;;  %v14_v8 = vld [vmem:[%s266_s0] sm:$0xff]  ;;  %v15_v10 = vld [vmem:[%s266_s0 + $0x8] sm:$0xff]  ;;  %v17_v11 = vld [vmem:[%s266_s0 + $0x18] sm:$0xff] }
   0x5   :  { %159 = vmatpush3.msra.mxu0 %v24_v1  ;;  %187 = vmatpush3.msra.mxu1 %v24_v1  ;;  %v139_v12 = vld [vmem:[%s267_s2] ss:$0 sm:$0xff] }
   0x6   :  { %160 = vmatprep.subr.mxu0 %v23_v2  ;;  %180 = vmatprep.subr.mxu1 %v23_v2 }
   0x7   :  { %161 = vmatpush3.msra.mxu0 %v23_v2  ;;  %188 = vmatpush3.msra.mxu1 %v23_v2 }
   0x8   :  { %162 = vmatprep.subr.mxu0 %v22_v3  ;;  %181 = vmatprep.subr.mxu1 %v22_v3 }
   0x9   :  { %163 = vmatpush3.msra.mxu0 %v22_v3  ;;  %189 = vmatpush3.msra.mxu1 %v22_v3 }
   0xa   :  { %164 = vmatprep.subr.mxu0 %v21_v4  ;;  %182 = vmatprep.subr.mxu1 %v21_v4 }
   0xb   :  { %165 = vmatpush3.msra.mxu0 %v21_v4  ;;  %190 = vmatpush3.msra.mxu1 %v21_v4 }
   0xc   :  { %166 = vmatprep.subr.mxu0 %v20_v5  ;;  %183 = vmatprep.subr.mxu1 %v20_v5 }
   0xd   :  { %167 = vmatpush3.msra.mxu0 %v20_v5  ;;  %191 = vmatpush3.msra.mxu1 %v20_v5 }
   0xe   :  { %168 = vmatprep.subr.mxu0 %v19_v6  ;;  %184 = vmatprep.subr.mxu1 %v19_v6 }
   0xf   :  { %169 = vmatpush3.msra.mxu0 %v19_v6  ;;  %192 = vmatpush3.msra.mxu1 %v19_v6 }
  0x10   :  { %170 = vmatprep.subr.mxu0 %v18_v7  ;;  %185 = vmatprep.subr.mxu1 %v18_v7 }
  0x11   :  { %171 = vmatpush3.msra.mxu0 %v18_v7  ;;  %193 = vmatpush3.msra.mxu1 %v18_v7 }
  0x12   :  { %172 = vmatprep.mubr.msk.f32.mxu0 %vm33_vm0, %v14_v8  ;;  %175 = vmatprep.mubr.msk.f32.mxu1 %vm33_vm0, %v16_v9 }
  0x13   :  { %173 = vmatmul.mubr.msk.f32.vlgmr.msra.gmra.mxu0 %vm33_vm0, %v15_v10  ;;  %176 = vmatmul.mubr.msk.f32.vlgmr.msra.gmra.mxu1 %vm33_vm0, %v17_v11 }
  0xd3   :  { %v174_v13 = vpop.f32.mrf.mxu0  ;;  %v177_v14 = vpop.f32.mrf.mxu1 }
  0xd4   :  { %v118_v15 = vadd.f32 %v174_v13, %v139_v12  ;;  %v128_v16 = vadd.f32 %v177_v14, %v139_v12 }
  0xd5   :  { %v112_v17 = vpop.f32.mrf.mxu0  ;;  %v122_v18 = vpop.f32.mrf.mxu1 }
  0xd6   :  { %132 = vst [vmem:[%s268_s3 + $0x8] sm:$0xff] %v118_v15  ;;  %134 = vst [vmem:[%s268_s3 + $0x18] sm:$0xff] %v128_v16  ;;  %v113_v19 = vadd.f32 %v139_v12, %v112_v17  ;;  %v123_v20 = vadd.f32 %v139_v12, %v122_v18 }
  0xd8   :  { %131 = vst [vmem:[%s268_s3] sm:$0xff] %v113_v19  ;;  %133 = vst [vmem:[%s268_s3 + $0x10] sm:$0xff] %v123_v20 }

// kernel: _lambda_.15
= control target key start
LH: loop header
LB: loop body
LE: loop exit
PB: predicated region body
PF: predicated region fallthrough
CT: control target
= control target key end

     0   :  { %v206_v0 = vmov 0.0   ;;  %vm33_vm0 = vcmask 261120   ;;  %vm207_vm1 = vmmov 0   ;;  %s298_s1 = inlined_call_operand.vmem [shape: f32[32,128], index: 1, kind: input, shape index: {}]   ;;  %s299_s0 = inlined_call_operand.vmem [shape: f32[40,32], index: 0, kind: input, shape index: {}]   ;;  %s300_s2 = inlined_call_operand.vmem [shape: f32[1,128], index: 2, kind: input, shape index: {}]   ;;  %s301_s3 = inlined_call_operand.vmem [shape: f32[40,128], index: 3, kind: input, shape index: {}]   ;;  %s302_s4 = inlined_call_operand.vmem [shape: f32[40,128], index: 4, kind: output, shape index: {}]  }
   0x1   :  { %173 = vmatprep.subr.mxu0 %v206_v0  ;;  %v25_v1 = vld [vmem:[%s298_s1 + $0x18] sm:$0xff]  ;;  %196 = vmatprep.subr.mxu1 %v206_v0  ;;  %v24_v2 = vld [vmem:[%s298_s1 + $0x10] sm:$0xff]  ;;  %v23_v3 = vld [vmem:[%s298_s1 + $0x8] sm:$0xff] }
   0x2   :  { %174 = vmatpush3.msra.mxu0 %v25_v1  ;;  %200 = vmatpush3.msra.mxu1 %v25_v1  ;;  %v22_v4 = vld [vmem:[%s298_s1] sm:$0xff]  ;;  %v20_v6 = vld [vmem:[%s299_s0 + $0x18] sm:$0xff]  ;;  %v18_v7 = vld [vmem:[%s299_s0 + $0x8] sm:$0xff] }
   0x3   :  { %175 = vmatprep.subr.mxu0 %v206_v0  ;;  %197 = vmatprep.subr.mxu1 %v206_v0  ;;  %v17_v5 = vld [vmem:[%s299_s0] sm:$0xff]  ;;  %v19_v9 = vld [vmem:[%s299_s0 + $0x10] sm:$0xff]  ;;  %v142_v16 = vld [vmem:[%s301_s3 + $0x18] sm:$0xff] }
   0x4   :  { %176 = vmatpush3.msra.mxu0 %v24_v2  ;;  %201 = vmatpush3.msra.mxu1 %v24_v2  ;;  %v21_v8 = vld [vmem:[%s299_s0 + $0x20] sm:$0xff]  ;;  %v140_v20 = vld [vmem:[%s301_s3 + $0x8] sm:$0xff]  ;;  %v141_v30 = vld [vmem:[%s301_s3 + $0x10] sm:$0xff] }
   0x5   :  { %177 = vmatprep.subr.mxu0 %v206_v0  ;;  %198 = vmatprep.subr.mxu1 %v206_v0  ;;  %v158_v10 = vld [vmem:[%s300_s2] ss:$0 sm:$0xff] }
   0x6   :  { %178 = vmatpush3.msra.mxu0 %v23_v3  ;;  %202 = vmatpush3.msra.mxu1 %v23_v3  ;;  %v139_v12 = vld [vmem:[%s301_s3] sm:$0xff] }
   0x7   :  { %179 = vmatprep.subr.mxu0 %v206_v0  ;;  %181 = vmatprep.mubr.msk.f32.mxu0 %vm207_vm1, %v206_v0  ;;  %v143_v26 = vld [vmem:[%s301_s3 + $0x20] sm:$0xff] }
   0x8   :  { %180 = vmatpush3.msra.mxu0 %v22_v4  ;;  %199 = vmatprep.subr.mxu1 %v206_v0 }
   0x9   :  { %182 = vmatmul.mubr.msk.f32.vlgmr.msra.gmra.mxu0 %vm33_vm0, %v17_v5  ;;  %203 = vmatpush3.msra.mxu1 %v22_v4 }
   0xa   :  { %190 = vmatprep.mubr.msk.f32.mxu1 %vm207_vm1, %v206_v0  ;;  %184 = vmatprep.mubr.msk.f32.mxu0 %vm207_vm1, %v206_v0 }
   0xb   :  { %191 = vmatmul.mubr.msk.f32.vlgmr.msra.gmra.mxu1 %vm33_vm0, %v20_v6 }
   0xc   :  { %193 = vmatprep.mubr.msk.f32.mxu1 %vm207_vm1, %v206_v0 }
   0xd   :  { %185 = vmatmul.mubr.msk.f32.gmra.mxu0 %vm33_vm0, %v18_v7 }
   0xe   :  { %187 = vmatprep.mubr.msk.f32.mxu0 %vm207_vm1, %v206_v0 }
   0xf   :  { %194 = vmatmul.mubr.msk.f32.gmra.mxu1 %vm33_vm0, %v21_v8 }
  0x11   :  { %188 = vmatmul.mubr.msk.f32.gmra.mxu0 %vm33_vm0, %v19_v9 }
  0xc9   :  { %v115_v11 = vpop.f32.mrf.mxu0 }
  0xca   :  { %v116_v13 = vadd.f32 %v158_v10, %v115_v11 }
  0xcb   :  { %v183_v14 = vpop.f32.mrf.mxu0  ;;  %v130_v15 = vpop.f32.mrf.mxu1 }
  0xcc   :  { %v144_v17 = vadd.f32 %v139_v12, %v116_v13  ;;  %v131_v18 = vadd.f32 %v158_v10, %v130_v15 }
  0xcd   :  { %v120_v19 = vpop.f32.mrf.mxu0  ;;  %v192_v21 = vpop.f32.mrf.mxu1 }
  0xce   :  { %149 = vst [vmem:[%s302_s4] sm:$0xff] %v144_v17  ;;  %v147_v22 = vadd.f32 %v142_v16, %v131_v18  ;;  %v121_v23 = vadd.f32 %v158_v10, %v120_v19 }
  0xcf   :  { %v186_v24 = vpop.f32.mrf.mxu0  ;;  %v135_v25 = vpop.f32.mrf.mxu1 }
  0xd0   :  { %152 = vst [vmem:[%s302_s4 + $0x18] sm:$0xff] %v147_v22  ;;  %v145_v27 = vadd.f32 %v140_v20, %v121_v23  ;;  %v136_v28 = vadd.f32 %v158_v10, %v135_v25 }
  0xd1   :  { %v125_v29 = vpop.f32.mrf.mxu0  ;;  %v195_v31 = vpop.f32.mrf.mxu1 }
  0xd2   :  { %150 = vst [vmem:[%s302_s4 + $0x8] sm:$0xff] %v145_v27  ;;  %v148_v32 = vadd.f32 %v143_v26, %v136_v28  ;;  %v126_v33 = vadd.f32 %v158_v10, %v125_v29 }
  0xd3   :  { %v189_v34 = vpop.f32.mrf.mxu0 }
  0xd4   :  { %153 = vst [vmem:[%s302_s4 + $0x20] sm:$0xff] %v148_v32  ;;  %v146_v35 = vadd.f32 %v141_v30, %v126_v33 }
  0xd6   :  { %151 = vst [vmem:[%s302_s4 + $0x10] sm:$0xff] %v146_v35 }

// kernel: _lambda_.17
= control target key start
LH: loop header
LB: loop body
LE: loop exit
PB: predicated region body
PF: predicated region fallthrough
CT: control target
= control target key end

     0   :  { %v230_v0 = vmov 0.0   ;;  %vm37_vm0 = vcmask 523264   ;;  %vm231_vm1 = vmmov 0   ;;  %s334_s1 = inlined_call_operand.vmem [shape: f32[64,128], index: 1, kind: input, shape index: {}]   ;;  %s335_s0 = inlined_call_operand.vmem [shape: f32[40,64], index: 0, kind: input, shape index: {}]   ;;  %s336_s2 = inlined_call_operand.vmem [shape: f32[1,128], index: 2, kind: input, shape index: {}]   ;;  %s337_s3 = inlined_call_operand.vmem [shape: f32[40,128], index: 3, kind: input, shape index: {}]   ;;  %s338_s4 = inlined_call_operand.vmem [shape: f32[40,128], index: 4, kind: output, shape index: {}]  }
   0x1   :  { %181 = vmatprep.subr.mxu0 %v230_v0  ;;  %v29_v1 = vld [vmem:[%s334_s1 + $0x38] sm:$0xff]  ;;  %212 = vmatprep.subr.mxu1 %v230_v0  ;;  %v28_v2 = vld [vmem:[%s334_s1 + $0x30] sm:$0xff]  ;;  %v27_v3 = vld [vmem:[%s334_s1 + $0x28] sm:$0xff] }
   0x2   :  { %182 = vmatpush3.msra.mxu0 %v29_v1  ;;  %220 = vmatpush3.msra.mxu1 %v29_v1  ;;  %v26_v4 = vld [vmem:[%s334_s1 + $0x20] sm:$0xff]  ;;  %v25_v5 = vld [vmem:[%s334_s1 + $0x18] sm:$0xff]  ;;  %v24_v6 = vld [vmem:[%s334_s1 + $0x10] sm:$0xff] }
   0x3   :  { %183 = vmatprep.subr.mxu0 %v230_v0  ;;  %213 = vmatprep.subr.mxu1 %v230_v0  ;;  %v23_v7 = vld [vmem:[%s334_s1 + $0x8] sm:$0xff]  ;;  %v22_v8 = vld [vmem:[%s334_s1] sm:$0xff]  ;;  %v20_v10 = vld [vmem:[%s335_s0 + $0x18] sm:$0xff] }
   0x4   :  { %184 = vmatpush3.msra.mxu0 %v28_v2  ;;  %221 = vmatpush3.msra.mxu1 %v28_v2  ;;  %v17_v9 = vld [vmem:[%s335_s0] sm:$0xff]  ;;  %v18_v11 = vld [vmem:[%s335_s0 + $0x8] sm:$0xff]  ;;  %v19_v13 = vld [vmem:[%s335_s0 + $0x10] sm:$0xff] }
   0x5   :  { %185 = vmatprep.subr.mxu0 %v230_v0  ;;  %214 = vmatprep.subr.mxu1 %v230_v0  ;;  %v21_v12 = vld [vmem:[%s335_s0 + $0x20] sm:$0xff]  ;;  %v146_v20 = vld [vmem:[%s337_s3 + $0x18] sm:$0xff]  ;;  %v144_v24 = vld [vmem:[%s337_s3 + $0x8] sm:$0xff] }
   0x6   :  { %186 = vmatpush3.msra.mxu0 %v27_v3  ;;  %222 = vmatpush3.msra.mxu1 %v27_v3  ;;  %v162_v14 = vld [vmem:[%s336_s2] ss:$0 sm:$0xff]  ;;  %v145_v34 = vld [vmem:[%s337_s3 + $0x10] sm:$0xff] }
   0x7   :  { %187 = vmatprep.subr.mxu0 %v230_v0  ;;  %215 = vmatprep.subr.mxu1 %v230_v0  ;;  %v143_v16 = vld [vmem:[%s337_s3] sm:$0xff] }
   0x8   :  { %188 = vmatpush3.msra.mxu0 %v26_v4  ;;  %223 = vmatpush3.msra.mxu1 %v26_v4  ;;  %v147_v30 = vld [vmem:[%s337_s3 + $0x20] sm:$0xff] }
   0x9   :  { %189 = vmatprep.subr.mxu0 %v230_v0  ;;  %216 = vmatprep.subr.mxu1 %v230_v0 }
   0xa   :  { %190 = vmatpush3.msra.mxu0 %v25_v5  ;;  %224 = vmatpush3.msra.mxu1 %v25_v5 }
   0xb   :  { %191 = vmatprep.subr.mxu0 %v230_v0  ;;  %217 = vmatprep.subr.mxu1 %v230_v0 }
   0xc   :  { %192 = vmatpush3.msra.mxu0 %v24_v6  ;;  %225 = vmatpush3.msra.mxu1 %v24_v6 }
   0xd   :  { %193 = vmatprep.subr.mxu0 %v230_v0  ;;  %218 = vmatprep.subr.mxu1 %v230_v0 }
   0xe   :  { %194 = vmatpush3.msra.mxu0 %v23_v7  ;;  %226 = vmatpush3.msra.mxu1 %v23_v7 }
   0xf   :  { %195 = vmatprep.subr.mxu0 %v230_v0  ;;  %197 = vmatprep.mubr.msk.f32.mxu0 %vm231_vm1, %v230_v0 }
  0x10   :  { %196 = vmatpush3.msra.mxu0 %v22_v8  ;;  %219 = vmatprep.subr.mxu1 %v230_v0 }
  0x11   :  { %198 = vmatmul.mubr.msk.f32.vlgmr.msra.gmra.mxu0 %vm37_vm0, %v17_v9  ;;  %227 = vmatpush3.msra.mxu1 %v22_v8 }
  0x12   :  { %206 = vmatprep.mubr.msk.f32.mxu1 %vm231_vm1, %v230_v0  ;;  %200 = vmatprep.mubr.msk.f32.mxu0 %vm231_vm1, %v230_v0 }
  0x13   :  { %207 = vmatmul.mubr.msk.f32.vlgmr.msra.gmra.mxu1 %vm37_vm0, %v20_v10 }
  0x14   :  { %209 = vmatprep.mubr.msk.f32.mxu1 %vm231_vm1, %v230_v0 }
  0x15   :  { %201 = vmatmul.mubr.msk.f32.gmra.mxu0 %vm37_vm0, %v18_v11 }
  0x16   :  { %203 = vmatprep.mubr.msk.f32.mxu0 %vm231_vm1, %v230_v0 }
  0x17   :  { %210 = vmatmul.mubr.msk.f32.gmra.mxu1 %vm37_vm0, %v21_v12 }
  0x19   :  { %204 = vmatmul.mubr.msk.f32.gmra.mxu0 %vm37_vm0, %v19_v13 }
  0xd1   :  { %v119_v15 = vpop.f32.mrf.mxu0 }
  0xd2   :  { %v120_v17 = vadd.f32 %v162_v14, %v119_v15 }
  0xd3   :  { %v199_v18 = vpop.f32.mrf.mxu0  ;;  %v134_v19 = vpop.f32.mrf.mxu1 }
  0xd4   :  { %v148_v21 = vadd.f32 %v143_v16, %v120_v17  ;;  %v135_v22 = vadd.f32 %v162_v14, %v134_v19 }
  0xd5   :  { %v124_v23 = vpop.f32.mrf.mxu0  ;;  %v208_v25 = vpop.f32.mrf.mxu1 }
  0xd6   :  { %153 = vst [vmem:[%s338_s4] sm:$0xff] %v148_v21  ;;  %v151_v26 = vadd.f32 %v146_v20, %v135_v22  ;;  %v125_v27 = vadd.f32 %v162_v14, %v124_v23 }
  0xd7   :  { %v202_v28 = vpop.f32.mrf.mxu0  ;;  %v139_v29 = vpop.f32.mrf.mxu1 }
  0xd8   :  { %156 = vst [vmem:[%s338_s4 + $0x18] sm:$0xff] %v151_v26  ;;  %v149_v31 = vadd.f32 %v144_v24, %v125_v27  ;;  %v140_v32 = vadd.f32 %v162_v14, %v139_v29 }
  0xd9   :  { %v129_v33 = vpop.f32.mrf.mxu0  ;;  %v211_v35 = vpop.f32.mrf.mxu1 }
  0xda   :  { %154 = vst [vmem:[%s338_s4 + $0x8] sm:$0xff] %v149_v31  ;;  %v152_v36 = vadd.f32 %v147_v30, %v140_v32  ;;  %v130_v37 = vadd.f32 %v162_v14, %v129_v33 }
  0xdb   :  { %v205_v38 = vpop.f32.mrf.mxu0 }
  0xdc   :  { %157 = vst [vmem:[%s338_s4 + $0x20] sm:$0xff] %v152_v36  ;;  %v150_v39 = vadd.f32 %v145_v34, %v130_v37 }
  0xde   :  { %155 = vst [vmem:[%s338_s4 + $0x10] sm:$0xff] %v150_v39 }

// kernel: _lambda_.16
= control target key start
LH: loop header
LB: loop body
LE: loop exit
PB: predicated region body
PF: predicated region fallthrough
CT: control target
= control target key end

     0   :  { %vm29_vm0 = vcmask 261120   ;;  %v371_v35 = vmov 0.0   ;;  %vm372_vm1 = vmmov 0   ;;  %s517_s0 = inlined_call_operand.vmem [shape: f32[40,32], index: 0, kind: input, shape index: {}]   ;;  %s518_s3 = inlined_call_operand.vmem [shape: f32[32,128], index: 3, kind: input, shape index: {}]   ;;  %s519_s1 = inlined_call_operand.vmem [shape: f32[1,32], index: 1, kind: input, shape index: {}]   ;;  %s520_s2 = inlined_call_operand.vmem [shape: f32[1,32], index: 2, kind: input, shape index: {}]   ;;  %s521_s4 = inlined_call_operand.vmem [shape: f32[1,128], index: 4, kind: input, shape index: {}]   ;;  %s522_s5 = inlined_call_operand.vmem [shape: f32[40,128], index: 5, kind: output, shape index: {}]  }
   0x1   :  { %v24_v0 = vld [vmem:[%s517_s0] sm:$0xff]  ;;  %v27_v1 = vld [vmem:[%s517_s0 + $0x18] sm:$0xff]  ;;  %v25_v2 = vld [vmem:[%s517_s0 + $0x8] sm:$0xff]  ;;  %318 = vmatprep.subr.mxu0 %v371_v35  ;;  %341 = vmatprep.subr.mxu1 %v371_v35 }
   0x2   :  { %v30_v3 = vsel %vm29_vm0, %v24_v0, 0.0  ;;  %v39_v4 = vsel %vm29_vm0, %v27_v1, 0.0  ;;  %v26_v5 = vld [vmem:[%s517_s0 + $0x10] sm:$0xff]  ;;  %v33_v6 = vsel %vm29_vm0, %v25_v2, 0.0  ;;  %v28_v8 = vld [vmem:[%s517_s0 + $0x20] sm:$0xff]  ;;  %v133_v36 = vld [vmem:[%s518_s3 + $0x18] sm:$0xff]  ;;  %326 = vmatprep.mubr.msk.f32.mxu0 %vm372_vm1, %v371_v35  ;;  %335 = vmatprep.mubr.msk.f32.mxu1 %vm372_vm1, %v371_v35 }
   0x3   :  { %31 = vadd.xlane.f32.xlu0 %v30_v3  ;;  %40 = vadd.xlane.f32.xlu1 %v39_v4  ;;  %v36_v7 = vsel %vm29_vm0, %v26_v5, 0.0  ;;  %v42_v9 = vsel %vm29_vm0, %v28_v8, 0.0  ;;  %v132_v37 = vld [vmem:[%s518_s3 + $0x10] sm:$0xff]  ;;  %v131_v38 = vld [vmem:[%s518_s3 + $0x8] sm:$0xff]  ;;  %v130_v39 = vld [vmem:[%s518_s3] sm:$0xff] }
   0x4   :  { %319 = vmatpush3.msra.mxu0 %v133_v36  ;;  %345 = vmatpush3.msra.mxu1 %v133_v36  ;;  %v301_v56 = vld [vmem:[%s519_s1] ss:$0 sm:$0xff] }
   0x5   :  { %320 = vmatprep.subr.mxu0 %v371_v35  ;;  %342 = vmatprep.subr.mxu1 %v371_v35  ;;  %v302_v58 = vld [vmem:[%s520_s2] ss:$0 sm:$0xff] }
   0x6   :  { %321 = vmatpush3.msra.mxu0 %v132_v37  ;;  %346 = vmatpush3.msra.mxu1 %v132_v37 }
   0x7   :  { %34 = vadd.xlane.f32.xlu0 %v33_v6  ;;  %37 = vadd.xlane.f32.xlu1 %v36_v7 }
   0x8   :  { %322 = vmatprep.subr.mxu0 %v371_v35  ;;  %343 = vmatprep.subr.mxu1 %v371_v35 }
   0x9   :  { %323 = vmatpush3.msra.mxu0 %v131_v38  ;;  %347 = vmatpush3.msra.mxu1 %v131_v38 }
   0xa   :  { %324 = vmatprep.subr.mxu0 %v371_v35  ;;  %344 = vmatprep.subr.mxu1 %v371_v35 }
   0xb   :  { %43 = vadd.xlane.f32.xlu0 %v42_v9  ;;  %325 = vmatpush3.msra.mxu0 %v130_v39 }
   0xc   :  { %348 = vmatpush3.msra.mxu1 %v130_v39 }
  0x8c   :  { %v32_v10 = vpop.xlane.xlu0 %31  ;;  %v41_v11 = vpop.xlane.xlu1 %40 }
  0x8d   :  { %v46_v12 = vmul.f32 0.03125, %v32_v10  ;;  %v49_v13 = vmul.f32 0.03125, %v41_v11 }
  0x8f   :  { %v423_v14 = vsub.f32 %v24_v0, %v46_v12  ;;  %v425_v15 = vsub.f32 %v27_v1, %v49_v13 }
  0x90   :  { %v35_v16 = vpop.xlane.xlu0 %34  ;;  %v38_v17 = vpop.xlane.xlu1 %37 }
  0x91   :  { %v47_v18 = vmul.f32 0.03125, %v35_v16  ;;  %v48_v19 = vmul.f32 0.03125, %v38_v17  ;;  %v56_v20 = vmul.f32 %v423_v14, %v423_v14  ;;  %v59_v21 = vmul.f32 %v425_v15, %v425_v15 }
  0x93   :  { %v431_v22 = vsub.f32 %v25_v2, %v47_v18  ;;  %v433_v23 = vsub.f32 %v26_v5, %v48_v19  ;;  %v61_v24 = vsel %vm29_vm0, %v56_v20, 0.0  ;;  %v70_v27 = vsel %vm29_vm0, %v59_v21, 0.0  ;;  %v303_v18 = vld [vmem:[%s521_s4] ss:$0 sm:$0xff] }
  0x94   :  { %62 = vadd.xlane.f32.xlu1 %v61_v24  ;;  %v44_v25 = vpop.xlane.xlu0 %43 }
  0x95   :  { %v50_v26 = vmul.f32 0.03125, %v44_v25  ;;  %v57_v28 = vmul.f32 %v431_v22, %v431_v22  ;;  %v58_v29 = vmul.f32 %v433_v23, %v433_v23 }
  0x97   :  { %v441_v30 = vsub.f32 %v28_v8, %v50_v26  ;;  %v64_v31 = vsel %vm29_vm0, %v57_v28, 0.0  ;;  %v67_v32 = vsel %vm29_vm0, %v58_v29, 0.0 }
  0x98   :  { %71 = vadd.xlane.f32.xlu1 %v70_v27  ;;  %65 = vadd.xlane.f32.xlu0 %v64_v31 }
  0x99   :  { %v60_v33 = vmul.f32 %v441_v30, %v441_v30 }
  0x9b   :  { %v73_v34 = vsel %vm29_vm0, %v60_v33, 0.0 }
  0x9c   :  { %68 = vadd.xlane.f32.xlu0 %v67_v32  ;;  %74 = vadd.xlane.f32.xlu1 %v73_v34 }
 0x11d   :  { %v63_v40 = vpop.xlane.xlu1 %62 }
 0x11e   :  { %v76_v41 = vmul.f32 0.03125, %v63_v40 }
 0x120   :  { %v81_v42 = vadd.f32 1e-05, %v76_v41 }
 0x121   :  { %v72_v43 = vpop.xlane.xlu1 %71  ;;  %v66_v44 = vpop.xlane.xlu0 %65 }
 0x122   :  { %351 = vrsqrt.f32 %v81_v42  ;;  %v79_v45 = vmul.f32 0.03125, %v72_v43  ;;  %v77_v46 = vmul.f32 0.03125, %v66_v44 }
 0x124   :  { %v84_v47 = vadd.f32 1e-05, %v79_v45  ;;  %v82_v48 = vadd.f32 1e-05, %v77_v46 }
 0x125   :  { %v75_v49 = vpop.xlane.xlu1 %74  ;;  %v69_v50 = vpop.xlane.xlu0 %68 }
 0x126   :  { %353 = vrsqrt.f32 %v84_v47  ;;  %v80_v51 = vmul.f32 0.03125, %v75_v49  ;;  %v78_v52 = vmul.f32 0.03125, %v69_v50 }
 0x127   :  { %355 = vrsqrt.f32 %v82_v48 }
 0x128   :  { %v85_v53 = vadd.f32 1e-05, %v80_v51  ;;  %v83_v54 = vadd.f32 1e-05, %v78_v52 }
 0x12a   :  { %357 = vrsqrt.f32 %v85_v53 }
 0x12b   :  { %359 = vrsqrt.f32 %v83_v54 }
 0x12f   :  { %v352_v55 = vpop.eup %351 }
 0x130   :  { %v91_v57 = vmul.f32 %v352_v55, %v423_v14 }
 0x132   :  { %v103_v59 = vmul.f32 %v301_v56, %v91_v57 }
 0x133   :  { %v354_v60 = vpop.eup %353 }
 0x134   :  { %v356_v61 = vpop.eup %355  ;;  %v115_v62 = vadd.f32 %v302_v58, %v103_v59  ;;  %v94_v63 = vmul.f32 %v354_v60, %v425_v15 }
 0x135   :  { %v92_v0 = vmul.f32 %v356_v61, %v431_v22 }
 0x136   :  { %120 = vst.msk [vmem:[#allocation2] sm:$0xff] %vm29_vm0, %v115_v62  ;;  %v106_v1 = vmul.f32 %v301_v56, %v94_v63 }
 0x137   :  { %v358_v2 = vpop.eup %357  ;;  %v104_v3 = vmul.f32 %v301_v56, %v92_v0 }
 0x138   :  { %v360_v4 = vpop.eup %359  ;;  %v118_v5 = vadd.f32 %v302_v58, %v106_v1  ;;  %v95_v6 = vmul.f32 %v358_v2, %v441_v30 }
 0x139   :  { %v116_v7 = vadd.f32 %v302_v58, %v104_v3  ;;  %v93_v8 = vmul.f32 %v360_v4, %v433_v23 }
 0x13a   :  { %123 = vst.msk [vmem:[#allocation2 + $0x18] sm:$0xff] %vm29_vm0, %v118_v5  ;;  %v107_v9 = vmul.f32 %v301_v56, %v95_v6 }
 0x13b   :  { %121 = vst.msk [vmem:[#allocation2 + $0x8] sm:$0xff] %vm29_vm0, %v116_v7  ;;  %v105_v10 = vmul.f32 %v301_v56, %v93_v8 }
 0x13c   :  { %v119_v11 = vadd.f32 %v302_v58, %v107_v9 }
 0x13d   :  { %v117_v12 = vadd.f32 %v302_v58, %v105_v10  ;;  %v125_v13 = vld [vmem:[#allocation2] sm:$0xff] }
 0x13e   :  { %124 = vst.msk [vmem:[#allocation2 + $0x20] sm:$0xff] %vm29_vm0, %v119_v11  ;;  %327 = vmatmul.mubr.msk.f32.vlgmr.msra.gmra.mxu0 %vm29_vm0, %v125_v13 }
 0x13f   :  { %122 = vst.msk [vmem:[#allocation2 + $0x10] sm:$0xff] %vm29_vm0, %v117_v12  ;;  %329 = vmatprep.mubr.msk.f32.mxu0 %vm372_vm1, %v371_v35 }
 0x141   :  { %v128_v14 = vld [vmem:[#allocation2 + $0x18] sm:$0xff] }
 0x142   :  { %v126_v15 = vld [vmem:[#allocation2 + $0x8] sm:$0xff]  ;;  %336 = vmatmul.mubr.msk.f32.vlgmr.msra.gmra.mxu1 %vm29_vm0, %v128_v14 }
 0x143   :  { %330 = vmatmul.mubr.msk.f32.gmra.mxu0 %vm29_vm0, %v126_v15  ;;  %338 = vmatprep.mubr.msk.f32.mxu1 %vm372_vm1, %v371_v35 }
 0x144   :  { %332 = vmatprep.mubr.msk.f32.mxu0 %vm372_vm1, %v371_v35 }
 0x145   :  { %v129_v16 = vld [vmem:[#allocation2 + $0x20] sm:$0xff] }
 0x146   :  { %v127_v17 = vld [vmem:[#allocation2 + $0x10] sm:$0xff]  ;;  %339 = vmatmul.mubr.msk.f32.gmra.mxu1 %vm29_vm0, %v129_v16 }
 0x147   :  { %333 = vmatmul.mubr.msk.f32.gmra.mxu0 %vm29_vm0, %v127_v17 }
 0x1fe   :  { %v223_v19 = vpop.f32.mrf.mxu0 }
 0x1ff   :  { %v224_v20 = vadd.f32 %v303_v18, %v223_v19 }
 0x200   :  { %v328_v21 = vpop.f32.mrf.mxu0 }
 0x201   :  { %v252_v22 = vmul.f32 0.044715, %v224_v20  ;;  %v247_v60 = vmul.f32 0.5, %v224_v20 }
 0x202   :  { %v238_v23 = vpop.f32.mrf.mxu1 }
 0x203   :  { %v257_v24 = vmul.f32 %v252_v22, %v224_v20  ;;  %v228_v25 = vpop.f32.mrf.mxu0  ;;  %v239_v26 = vadd.f32 %v303_v18, %v238_v23 }
 0x204   :  { %v229_v27 = vadd.f32 %v303_v18, %v228_v25  ;;  %v337_v28 = vpop.f32.mrf.mxu1 }
 0x205   :  { %v262_v29 = vmul.f32 %v257_v24, %v224_v20  ;;  %v255_v30 = vmul.f32 0.044715, %v239_v26  ;;  %v331_v31 = vpop.f32.mrf.mxu0  ;;  %v250_v1 = vmul.f32 0.5, %v239_v26 }
 0x206   :  { %v253_v32 = vmul.f32 0.044715, %v229_v27  ;;  %v243_v33 = vpop.f32.mrf.mxu1  ;;  %v248_v3 = vmul.f32 0.5, %v229_v27 }
 0x207   :  { %v267_v34 = vadd.f32 %v262_v29, %v224_v20  ;;  %v260_v35 = vmul.f32 %v255_v30, %v239_v26  ;;  %v233_v36 = vpop.f32.mrf.mxu0  ;;  %v244_v37 = vadd.f32 %v303_v18, %v243_v33 }
 0x208   :  { %v258_v38 = vmul.f32 %v253_v32, %v229_v27  ;;  %v234_v39 = vadd.f32 %v303_v18, %v233_v36  ;;  %v340_v40 = vpop.f32.mrf.mxu1 }
 0x209   :  { %v272_v41 = vmul.f32 0.7978846, %v267_v34  ;;  %v265_v42 = vmul.f32 %v260_v35, %v239_v26  ;;  %v256_v43 = vmul.f32 0.044715, %v244_v37  ;;  %v334_v44 = vpop.f32.mrf.mxu0  ;;  %v251_v9 = vmul.f32 0.5, %v244_v37 }
 0x20a   :  { %v263_v45 = vmul.f32 %v258_v38, %v229_v27  ;;  %v254_v46 = vmul.f32 0.044715, %v234_v39  ;;  %v249_v11 = vmul.f32 0.5, %v234_v39 }
 0x20b   :  { %361 = vtanh.f32 %v272_v41  ;;  %v270_v47 = vadd.f32 %v265_v42, %v239_v26  ;;  %v261_v48 = vmul.f32 %v256_v43, %v244_v37 }
 0x20c   :  { %v268_v49 = vadd.f32 %v263_v45, %v229_v27  ;;  %v259_v50 = vmul.f32 %v254_v46, %v234_v39 }
 0x20d   :  { %v275_v51 = vmul.f32 0.7978846, %v270_v47  ;;  %v266_v52 = vmul.f32 %v261_v48, %v244_v37 }
 0x20e   :  { %v273_v53 = vmul.f32 0.7978846, %v268_v49  ;;  %v264_v54 = vmul.f32 %v259_v50, %v234_v39 }
 0x20f   :  { %363 = vtanh.f32 %v275_v51  ;;  %v271_v55 = vadd.f32 %v266_v52, %v244_v37 }
 0x210   :  { %365 = vtanh.f32 %v273_v53  ;;  %v269_v56 = vadd.f32 %v264_v54, %v234_v39 }
 0x211   :  { %v276_v57 = vmul.f32 0.7978846, %v271_v55 }
 0x212   :  { %v274_v58 = vmul.f32 0.7978846, %v269_v56 }
 0x213   :  { %367 = vtanh.f32 %v276_v57 }
 0x214   :  { %369 = vtanh.f32 %v274_v58 }
 0x218   :  { %v362_v59 = vpop.eup %361 }
 0x219   :  { %v282_v61 = vadd.f32 1.0, %v362_v59 }
 0x21b   :  { %v287_v62 = vmul.f32 %v282_v61, %v247_v60 }
 0x21c   :  { %v364_v63 = vpop.eup %363 }
 0x21d   :  { %v366_v0 = vpop.eup %365  ;;  %292 = vst [vmem:[%s522_s5] sm:$0xff] %v287_v62  ;;  %v285_v2 = vadd.f32 1.0, %v364_v63 }
 0x21e   :  { %v283_v4 = vadd.f32 1.0, %v366_v0 }
 0x21f   :  { %v290_v5 = vmul.f32 %v285_v2, %v250_v1 }
 0x220   :  { %v368_v6 = vpop.eup %367  ;;  %v288_v7 = vmul.f32 %v283_v4, %v248_v3 }
 0x221   :  { %v370_v8 = vpop.eup %369  ;;  %295 = vst [vmem:[%s522_s5 + $0x18] sm:$0xff] %v290_v5  ;;  %v286_v10 = vadd.f32 1.0, %v368_v6 }
 0x222   :  { %293 = vst [vmem:[%s522_s5 + $0x8] sm:$0xff] %v288_v7  ;;  %v284_v12 = vadd.f32 1.0, %v370_v8 }
 0x223   :  { %v291_v13 = vmul.f32 %v286_v10, %v251_v9 }
 0x224   :  { %v289_v14 = vmul.f32 %v284_v12, %v249_v11 }
 0x225   :  { %296 = vst [vmem:[%s522_s5 + $0x20] sm:$0xff] %v291_v13 }
 0x226   :  { %294 = vst [vmem:[%s522_s5 + $0x10] sm:$0xff] %v289_v14 }

// kernel: _lambda_.23
= control target key start
LH: loop header
LB: loop body
LE: loop exit
PB: predicated region body
PF: predicated region fallthrough
CT: control target
= control target key end

     0   :  { %vm25_vm0 = vcmask 261120   ;;  %v172_v7 = vmov 0.0   ;;  %vm173_vm1 = vmmov 0   ;;  %s235_s0 = inlined_call_operand.vmem [shape: f32[8,32], index: 0, kind: input, shape index: {}]   ;;  %s236_s3 = inlined_call_operand.vmem [shape: f32[32,128], index: 3, kind: input, shape index: {}]   ;;  %s237_s1 = inlined_call_operand.vmem [shape: f32[1,32], index: 1, kind: input, shape index: {}]   ;;  %s238_s2 = inlined_call_operand.vmem [shape: f32[1,32], index: 2, kind: input, shape index: {}]   ;;  %s239_s4 = inlined_call_operand.vmem [shape: f32[1,128], index: 4, kind: input, shape index: {}]   ;;  %s240_s5 = inlined_call_operand.vmem [shape: f32[8,128], index: 5, kind: output, shape index: {}]  }
   0x1   :  { %v24_v0 = vld [vmem:[%s235_s0] sm:$0xff]  ;;  %157 = vmatprep.subr.mxu0 %v172_v7  ;;  %v61_v8 = vld [vmem:[%s236_s3 + $0x18] sm:$0xff]  ;;  %v60_v9 = vld [vmem:[%s236_s3 + $0x10] sm:$0xff]  ;;  %165 = vmatprep.mubr.msk.f32.mxu0 %vm173_vm1, %v172_v7 }
   0x2   :  { %v26_v1 = vsel %vm25_vm0, %v24_v0, 0.0  ;;  %158 = vmatpush3.msra.mxu0 %v61_v8  ;;  %v59_v10 = vld [vmem:[%s236_s3 + $0x8] sm:$0xff]  ;;  %v58_v11 = vld [vmem:[%s236_s3] sm:$0xff] }
   0x3   :  { %27 = vadd.xlane.f32.xlu0 %v26_v1  ;;  %159 = vmatprep.subr.mxu0 %v172_v7  ;;  %v148_v16 = vld [vmem:[%s237_s1] ss:$0 sm:$0xff] }
   0x4   :  { %160 = vmatpush3.msra.mxu0 %v60_v9  ;;  %v149_v18 = vld [vmem:[%s238_s2] ss:$0 sm:$0xff] }
   0x5   :  { %161 = vmatprep.subr.mxu0 %v172_v7  ;;  %v150_v22 = vld [vmem:[%s239_s4] ss:$0 sm:$0xff] }
   0x6   :  { %162 = vmatpush3.msra.mxu0 %v59_v10 }
   0x7   :  { %163 = vmatprep.subr.mxu0 %v172_v7 }
   0x8   :  { %164 = vmatpush3.msra.mxu0 %v58_v11 }
  0x8c   :  { %v28_v2 = vpop.xlane.xlu0 %27 }
  0x8d   :  { %v30_v3 = vmul.f32 0.03125, %v28_v2 }
  0x8f   :  { %v31_v4 = vsub.f32 %v24_v0, %v30_v3 }
  0x91   :  { %v32_v5 = vmul.f32 %v31_v4, %v31_v4 }
  0x93   :  { %v33_v6 = vsel %vm25_vm0, %v32_v5, 0.0 }
  0x94   :  { %34 = vadd.xlane.f32.xlu0 %v33_v6 }
 0x11d   :  { %v35_v12 = vpop.xlane.xlu0 %34 }
 0x11e   :  { %v36_v13 = vmul.f32 0.03125, %v35_v12 }
 0x120   :  { %v37_v14 = vadd.f32 1e-05, %v36_v13 }
 0x122   :  { %170 = vrsqrt.f32 %v37_v14 }
 0x12f   :  { %v171_v15 = vpop.eup %170 }
 0x130   :  { %v39_v17 = vmul.f32 %v171_v15, %v31_v4 }
 0x132   :  { %v47_v19 = vmul.f32 %v148_v16, %v39_v17 }
 0x134   :  { %v55_v20 = vadd.f32 %v149_v18, %v47_v19 }
 0x136   :  { %56 = vst.msk [vmem:[#allocation2] sm:$0xff] %vm25_vm0, %v55_v20 }
 0x13d   :  { %v57_v21 = vld [vmem:[#allocation2] sm:$0xff] }
 0x13e   :  { %166 = vmatmul.mubr.msk.f32.vlgmr.msra.gmra.mxu0 %vm25_vm0, %v57_v21 }
 0x1fe   :  { %v139_v23 = vpop.f32.mrf.mxu0 }
 0x1ff   :  { %v140_v24 = vadd.f32 %v150_v22, %v139_v23 }
 0x200   :  { %v167_v25 = vpop.f32.mrf.mxu0 }
 0x201   :  { %143 = vst [vmem:[%s240_s5] sm:$0xff] %v140_v24 }

</bundles_post_ra>
